<compile_context>
chip_gen: v5e
topology: v5e:2x2
jax: 0.10.0
libtpu: 0.0.40
codegen_flags: <defaults>
</compile_context>

<pallas_src>
import math
import functools

import jax
import jax.numpy as jnp
from jax.experimental import pallas as pl
from jax.experimental.pallas import tpu as pltpu


def _softplus(x):
    # Matches torch.nn.functional.softplus (beta=1, threshold=20).
    return jnp.where(x > 20.0, x, jnp.log1p(jnp.exp(jnp.minimum(x, 20.0))))


def low_policy_kernel(action_low, action_high, n_actions, exact_double_tanh,
                      state_ref, eps_ref,
                      w1t_ref, b1_ref, w2t_ref, b2_ref,
                      wheadt_ref, bhead_ref,
                      out_ref):
    # Feature-major: batch tile on the 128-lane axis.  The transpose of the
    # (tb, n_states) state tile is XLU work in an otherwise-idle slot.
    x_t = state_ref[...].T                                            # (n_states, tb)

    # fc1 -> relu
    h1 = jnp.dot(w1t_ref[...], x_t, preferred_element_type=jnp.float32) + b1_ref[...]
    h1 = jnp.maximum(h1, 0.0)                                         # (n_hidden, tb)

    # fc2 -> relu
    h2 = jnp.dot(w2t_ref[...], h1, preferred_element_type=jnp.float32) + b2_ref[...]
    h2 = jnp.maximum(h2, 0.0)                                         # (n_hidden, tb)

    # fused mu/std head: one MXU push, slice the two row-halves
    head = jnp.dot(wheadt_ref[...], h2, preferred_element_type=jnp.float32) + bhead_ref[...]
    mu = head[:n_actions, :]                                          # (n_actions, tb)
    std = _softplus(head[n_actions:, :])                              # (n_actions, tb)

    # reparameterized sample: dist.rsample() == mu + std * eps
    eps = eps_ref[...]                                                # (n_actions, tb)
    normal_sample = mu + std * eps

    # Normal(mu, std).log_prob(normal_sample); z = (x - mu)/std == eps exactly.
    half_log_2pi = 0.5 * math.log(2.0 * math.pi)
    log_prob = -jnp.log(std) - half_log_2pi - 0.5 * eps * eps

    # tanh squash.  NOTE: the PyTorch module applies tanh AGAIN inside the
    # correction term; reproduced exactly by default to preserve semantics.
    action = jnp.tanh(normal_sample)
    if exact_double_tanh:
        sq = jnp.tanh(action) ** 2
    else:
        sq = action * action  # standard SAC correction (opt-in only)
    log_prob = log_prob - jnp.log(1.0 - sq + 1e-07)
    lp_sum = jnp.sum(log_prob, axis=0, keepdims=True)                 # (1, tb)

    # scale by upper bound and clamp to [low, high]
    a = jnp.clip(action * action_high, action_low, action_high)

    # Single lane-dense store of the packed [action ; summed log_prob] block.
    out_ref[...] = jnp.concatenate([a, lp_sum], axis=0)               # (n_actions+1, tb)


def _pick_tb(B):
    # One big tile when B is modest (grid-step overhead dominates this body);
    # an even >=2-way split of large B so the 'parallel' grid axis can feed
    # both v7x TensorCores.  Multi-tile tb must be a multiple of 128 (lane rule).
    if B <= 1024:
        return B
    half = (B + 1) // 2
    return min(2048, ((half + 127) // 128) * 128)


def low_policy_forward(state, eps_fm, params, action_bound, *, tb=None,
                       exact_double_tanh=True):
    """state: (B, n_states) f32; eps_fm: (n_actions, B) f32 standard-normal noise
    (feature-major, i.e. already laid out with batch on the fast axis)."""
    B, n_states = state.shape
    n_actions = eps_fm.shape[0]
    assert eps_fm.shape[1] == B
    n_hidden = params["w1"].shape[1]
    action_low, action_high = float(action_bound[0]), float(action_bound[1])

    tb = _pick_tb(B) if tb is None else int(tb)
    if tb != B:
        assert tb % 128 == 0, "tb must be a multiple of 128 unless it equals B"
    grid = (pl.cdiv(B, tb),)   # ragged last tile masked by Pallas; no jnp.pad

    # Transpose the tiny weights once (feature-major: (out_features, in_features)),
    # and fuse the two head linears into one weight/bias.
    w1t = params["w1"].T                                       # (n_hidden, n_states)
    b1 = params["b1"].reshape(n_hidden, 1)
    w2t = params["w2"].T                                       # (n_hidden, n_hidden)
    b2 = params["b2"].reshape(n_hidden, 1)
    wheadt = jnp.concatenate([params["wmu"].T, params["wstd"].T], axis=0)   # (2*n_actions, n_hidden)
    bhead = jnp.concatenate([params["bmu"], params["bstd"]], axis=1).reshape(2 * n_actions, 1)

    kernel = functools.partial(low_policy_kernel, action_low, action_high,
                               n_actions, exact_double_tanh)

    batch_rows = lambda i: (i, 0)   # state: batch tile on dim 0
    batch_lane = lambda i: (0, i)   # eps / out: batch tile on dim 1 (lanes)
    resident = lambda i: (0, 0)     # weights stay VMEM-resident across grid steps

    out = pl.pallas_call(
        kernel,
        out_shape=jax.ShapeDtypeStruct((n_actions + 1, B), jnp.float32),
        grid_spec=pltpu.PrefetchScalarGridSpec(
            num_scalar_prefetch=0,
            grid=grid,
            in_specs=[
                pl.BlockSpec((tb, n_states), batch_rows),            # state
                pl.BlockSpec((n_actions, tb), batch_lane),           # eps (feature-major)
                pl.BlockSpec((n_hidden, n_states), resident),        # w1^T
                pl.BlockSpec((n_hidden, 1), resident),               # b1
                pl.BlockSpec((n_hidden, n_hidden), resident),        # w2^T
                pl.BlockSpec((n_hidden, 1), resident),               # b2
                pl.BlockSpec((2 * n_actions, n_hidden), resident),   # [wmu|wstd]^T
                pl.BlockSpec((2 * n_actions, 1), resident),          # [bmu|bstd]
            ],
            out_specs=pl.BlockSpec((n_actions + 1, tb), batch_lane),
        ),
        compiler_params=pltpu.CompilerParams(
            dimension_semantics=("parallel",)),
    )(state, eps_fm, w1t, b1, w2t, b2, wheadt, bhead)

    action = out[:n_actions, :].T          # (B, n_actions)
    log_prob = out[n_actions:, :].T        # (B, 1)
    return action, log_prob


def low_policy_ref(state, eps, params, action_bound):
    """Pure-JAX reference mirroring the PyTorch forward (eps: (B, n_actions))."""
    hp = jax.lax.Precision.HIGHEST
    x = jax.nn.relu(jnp.dot(state, params["w1"], precision=hp) + params["b1"])
    x = jax.nn.relu(jnp.dot(x, params["w2"], precision=hp) + params["b2"])
    mu = jnp.dot(x, params["wmu"], precision=hp) + params["bmu"]
    std = jax.nn.softplus(jnp.dot(x, params["wstd"], precision=hp) + params["bstd"])
    normal_sample = mu + std * eps
    z = (normal_sample - mu) / std
    log_prob = -jnp.log(std) - 0.5 * math.log(2.0 * math.pi) - 0.5 * z * z
    action = jnp.tanh(normal_sample)
    log_prob = log_prob - jnp.log(1.0 - jnp.tanh(action) ** 2 + 1e-07)
    log_prob = jnp.sum(log_prob, axis=-1, keepdims=True)
    action = jnp.clip(action * action_bound[1], action_bound[0], action_bound[1])
    return action, log_prob


def init_params(key, n_states, n_actions, n_hidden):
    """Deterministic init mimicking nn.Linear's U(-1/sqrt(fan_in), 1/sqrt(fan_in)).
    Weights stored as (in_features, out_features)."""
    ks = jax.random.split(key, 8)

    def linear(kw, kb, fan_in, fan_out):
        bound = 1.0 / math.sqrt(fan_in)
        w = jax.random.uniform(kw, (fan_in, fan_out), jnp.float32, -bound, bound)
        b = jax.random.uniform(kb, (1, fan_out), jnp.float32, -bound, bound)
        return w, b

    w1, b1 = linear(ks[0], ks[1], n_states, n_hidden)
    w2, b2 = linear(ks[2], ks[3], n_hidden, n_hidden)
    wmu, bmu = linear(ks[4], ks[5], n_hidden, n_actions)
    wstd, bstd = linear(ks[6], ks[7], n_hidden, n_actions)
    return dict(w1=w1, b1=b1, w2=w2, b2=b2,
                wmu=wmu, bmu=bmu, wstd=wstd, bstd=bstd)


if __name__ == "__main__":
    n_states, n_actions, n_hidden = 16, 4, 256   # module default n_hidden_filters=256
    action_bound = (-1.0, 1.0)

    key = jax.random.PRNGKey(0)
    k_param, k_data = jax.random.split(key, 2)
    params = init_params(k_param, n_states, n_actions, n_hidden)

    def check(B, tb):
        ks, ke = jax.random.split(jax.random.fold_in(k_data, B), 2)
        state = jax.random.normal(ks, (B, n_states), jnp.float32)
        eps_fm = jax.random.normal(ke, (n_actions, B), jnp.float32)   # feature-major noise

        action, log_prob = low_policy_forward(state, eps_fm, params, action_bound, tb=tb)
        jax.block_until_ready((action, log_prob))

        assert action.shape == (B, n_actions)
        assert log_prob.shape == (B, 1)
        assert bool(jnp.all(jnp.isfinite(action)))
        assert bool(jnp.all(jnp.isfinite(log_prob)))
        assert bool(jnp.all(action >= action_bound[0])) and bool(jnp.all(action <= action_bound[1]))

        ref_action, ref_log_prob = low_policy_ref(state, eps_fm.T, params, action_bound)
        assert bool(jnp.allclose(action, ref_action, atol=1e-4, rtol=1e-4)), f"action mismatch B={B} tb={tb}"
        assert bool(jnp.allclose(log_prob, ref_log_prob, atol=5e-4, rtol=5e-4)), f"log_prob mismatch B={B} tb={tb}"

    check(256, None)   # single full-B tile (grid=(1,)): the v5e/v6e sweet spot
    check(256, 128)    # even 2-way batch split: 'parallel' axis feeds both v7x cores
    check(200, 128)    # ragged last tile, no wrapper-side padding

    print("KERNEL_OK")
</pallas_src>

<mosaic_0001>
module attributes {stable_mosaic.version = 11 : i64} {
  func.func @low_policy_kernel(%arg0: i32, %arg1: memref<256x16xf32, #tpu.memory_space<vmem>>, %arg2: memref<4x256xf32, #tpu.memory_space<vmem>>, %arg3: memref<256x16xf32, #tpu.memory_space<vmem>>, %arg4: memref<256x1xf32, #tpu.memory_space<vmem>>, %arg5: memref<256x256xf32, #tpu.memory_space<vmem>>, %arg6: memref<256x1xf32, #tpu.memory_space<vmem>>, %arg7: memref<8x256xf32, #tpu.memory_space<vmem>>, %arg8: memref<8x1xf32, #tpu.memory_space<vmem>>, %arg9: memref<5x256xf32, #tpu.memory_space<vmem>>) attributes {dimension_semantics = [#tpu.dimension_semantics<parallel>], iteration_bounds = array<i64: 1>, scalar_prefetch = 0 : i64, scratch_operands = 0 : i64, tpu.core_type = #tpu.core_type<tc>, window_params = [{transform_indices = @transform_0, window_bounds = array<i64: 256, 16>}, {transform_indices = @transform_1, window_bounds = array<i64: 4, 256>}, {pipeline_mode = #tpu.pipeline_mode<synchronous>, transform_indices = @transform_2, window_bounds = array<i64: 256, 16>}, {pipeline_mode = #tpu.pipeline_mode<synchronous>, transform_indices = @transform_3, window_bounds = array<i64: 256, 1>}, {pipeline_mode = #tpu.pipeline_mode<synchronous>, transform_indices = @transform_4, window_bounds = array<i64: 256, 256>}, {pipeline_mode = #tpu.pipeline_mode<synchronous>, transform_indices = @transform_5, window_bounds = array<i64: 256, 1>}, {pipeline_mode = #tpu.pipeline_mode<synchronous>, transform_indices = @transform_6, window_bounds = array<i64: 8, 256>}, {pipeline_mode = #tpu.pipeline_mode<synchronous>, transform_indices = @transform_7, window_bounds = array<i64: 8, 1>}, {transform_indices = @transform_8, window_bounds = array<i64: 5, 256>}]} {
    %c0 = arith.constant 0 : index
    %c0_0 = arith.constant 0 : index
    %0 = vector.load %arg1[%c0, %c0_0] : memref<256x16xf32, #tpu.memory_space<vmem>>, vector<256x16xf32>
    %1 = tpu.transpose %0, [1, 0] : vector<256x16xf32> -> vector<16x256xf32>
    %c0_1 = arith.constant 0 : index
    %c0_2 = arith.constant 0 : index
    %2 = vector.load %arg3[%c0_1, %c0_2] : memref<256x16xf32, #tpu.memory_space<vmem>>, vector<256x16xf32>
    %cst = arith.constant dense<0.000000e+00> : vector<256x256xf32>
    %3 = tpu.matmul %2, %1, %cst {dimension_numbers = #tpu.dot_dimension_numbers<[1], [0], [0], [1], [0, 0, 1, 1], [], []>} : vector<256x16xf32>, vector<16x256xf32>, vector<256x256xf32> -> vector<256x256xf32>
    %c0_3 = arith.constant 0 : index
    %c0_4 = arith.constant 0 : index
    %4 = vector.load %arg4[%c0_3, %c0_4] : memref<256x1xf32, #tpu.memory_space<vmem>>, vector<256x1xf32>
    %5 = vector.broadcast %4 : vector<256x1xf32> to vector<256x256xf32>
    %6 = arith.addf %3, %5 : vector<256x256xf32>
    %cst_5 = arith.constant 0.000000e+00 : f32
    %7 = vector.broadcast %cst_5 : f32 to vector<256x256xf32>
    %8 = arith.maximumf %6, %7 : vector<256x256xf32>
    %c0_6 = arith.constant 0 : index
    %c0_7 = arith.constant 0 : index
    %9 = vector.load %arg5[%c0_6, %c0_7] : memref<256x256xf32, #tpu.memory_space<vmem>>, vector<256x256xf32>
    %cst_8 = arith.constant dense<0.000000e+00> : vector<256x256xf32>
    %10 = tpu.matmul %9, %8, %cst_8 {dimension_numbers = #tpu.dot_dimension_numbers<[1], [0], [0], [1], [0, 0, 1, 1], [], []>} : vector<256x256xf32>, vector<256x256xf32>, vector<256x256xf32> -> vector<256x256xf32>
    %c0_9 = arith.constant 0 : index
    %c0_10 = arith.constant 0 : index
    %11 = vector.load %arg6[%c0_9, %c0_10] : memref<256x1xf32, #tpu.memory_space<vmem>>, vector<256x1xf32>
    %12 = vector.broadcast %11 : vector<256x1xf32> to vector<256x256xf32>
    %13 = arith.addf %10, %12 : vector<256x256xf32>
    %cst_11 = arith.constant 0.000000e+00 : f32
    %14 = vector.broadcast %cst_11 : f32 to vector<256x256xf32>
    %15 = arith.maximumf %13, %14 : vector<256x256xf32>
    %c0_12 = arith.constant 0 : index
    %c0_13 = arith.constant 0 : index
    %16 = vector.load %arg7[%c0_12, %c0_13] : memref<8x256xf32, #tpu.memory_space<vmem>>, vector<8x256xf32>
    %cst_14 = arith.constant dense<0.000000e+00> : vector<8x256xf32>
    %17 = tpu.matmul %16, %15, %cst_14 {dimension_numbers = #tpu.dot_dimension_numbers<[1], [0], [0], [1], [0, 0, 1, 1], [], []>} : vector<8x256xf32>, vector<256x256xf32>, vector<8x256xf32> -> vector<8x256xf32>
    %c0_15 = arith.constant 0 : index
    %c0_16 = arith.constant 0 : index
    %18 = vector.load %arg8[%c0_15, %c0_16] : memref<8x1xf32, #tpu.memory_space<vmem>>, vector<8x1xf32>
    %19 = vector.broadcast %18 : vector<8x1xf32> to vector<8x256xf32>
    %20 = arith.addf %17, %19 : vector<8x256xf32>
    %21 = vector.extract_strided_slice %20 {offsets = [0, 0], sizes = [4, 256], strides = [1, 1]} : vector<8x256xf32> to vector<4x256xf32>
    %22 = vector.extract_strided_slice %20 {offsets = [4, 0], sizes = [4, 256], strides = [1, 1]} : vector<8x256xf32> to vector<4x256xf32>
    %cst_17 = arith.constant 2.000000e+01 : f32
    %23 = vector.broadcast %cst_17 : f32 to vector<4x256xf32>
    %24 = arith.cmpf ogt, %22, %23 : vector<4x256xf32>
    %cst_18 = arith.constant 2.000000e+01 : f32
    %25 = vector.broadcast %cst_18 : f32 to vector<4x256xf32>
    %26 = arith.minimumf %22, %25 : vector<4x256xf32>
    %27 = math.exp %26 : vector<4x256xf32>
    %28 = math.log1p %27 : vector<4x256xf32>
    %29 = arith.select %24, %22, %28 : vector<4x256xi1>, vector<4x256xf32>
    %c0_19 = arith.constant 0 : index
    %c0_20 = arith.constant 0 : index
    %30 = vector.load %arg2[%c0_19, %c0_20] : memref<4x256xf32, #tpu.memory_space<vmem>>, vector<4x256xf32>
    %31 = arith.mulf %29, %30 : vector<4x256xf32>
    %32 = arith.addf %21, %31 : vector<4x256xf32>
    %33 = math.log %29 : vector<4x256xf32>
    %cst_21 = arith.constant 0.000000e+00 : f32
    %34 = vector.broadcast %cst_21 : f32 to vector<4x256xf32>
    %35 = arith.subf %34, %33 : vector<4x256xf32>
    %cst_22 = arith.constant 0.918938517 : f32
    %36 = vector.broadcast %cst_22 : f32 to vector<4x256xf32>
    %37 = arith.subf %35, %36 : vector<4x256xf32>
    %cst_23 = arith.constant 5.000000e-01 : f32
    %38 = vector.broadcast %cst_23 : f32 to vector<4x256xf32>
    %39 = arith.mulf %38, %30 : vector<4x256xf32>
    %40 = arith.mulf %39, %30 : vector<4x256xf32>
    %41 = arith.subf %37, %40 : vector<4x256xf32>
    %42 = math.tanh %32 : vector<4x256xf32>
    %43 = math.tanh %42 : vector<4x256xf32>
    %44 = arith.mulf %43, %43 : vector<4x256xf32>
    %cst_24 = arith.constant 1.000000e+00 : f32
    %45 = vector.broadcast %cst_24 : f32 to vector<4x256xf32>
    %46 = arith.subf %45, %44 : vector<4x256xf32>
    %cst_25 = arith.constant 1.000000e-07 : f32
    %47 = vector.broadcast %cst_25 : f32 to vector<4x256xf32>
    %48 = arith.addf %46, %47 : vector<4x256xf32>
    %49 = math.log %48 : vector<4x256xf32>
    %50 = arith.subf %41, %49 : vector<4x256xf32>
    %cst_26 = arith.constant dense<0.000000e+00> : vector<256xf32>
    %51 = vector.multi_reduction <add>, %50, %cst_26 [0] : vector<4x256xf32> to vector<256xf32>
    %52 = vector.shape_cast %51 : vector<256xf32> to vector<1x256xf32>
    %cst_27 = arith.constant 1.000000e+00 : f32
    %53 = vector.broadcast %cst_27 : f32 to vector<4x256xf32>
    %54 = arith.mulf %42, %53 : vector<4x256xf32>
    %cst_28 = arith.constant -1.000000e+00 : f32
    %cst_29 = arith.constant 1.000000e+00 : f32
    %55 = vector.broadcast %cst_28 : f32 to vector<4x256xf32>
    %56 = arith.maximumf %55, %54 : vector<4x256xf32>
    %57 = vector.broadcast %cst_29 : f32 to vector<4x256xf32>
    %58 = arith.minimumf %57, %56 : vector<4x256xf32>
    %59 = tpu.concatenate %58, %52 in 0 : vector<4x256xf32>, vector<1x256xf32> -> vector<5x256xf32>
    %c0_30 = arith.constant 0 : index
    %c0_31 = arith.constant 0 : index
    %60 = vector.load %arg9[%c0_30, %c0_31] : memref<5x256xf32, #tpu.memory_space<vmem>>, vector<5x256xf32>
    tpu.vector_store %arg9[%c0_30, %c0_31], %59 {strides = array<i32>} : memref<5x256xf32, #tpu.memory_space<vmem>>, vector<5x256xf32>,
    return
  }
  func.func @transform_0(%arg0: i32) -> (i32, i32) {
    %c0_i32 = arith.constant 0 : i32
    %c0_i32_0 = arith.constant 0 : i32
    return %arg0, %c0_i32 : i32, i32
  }
  func.func @transform_1(%arg0: i32) -> (i32, i32) {
    %c0_i32 = arith.constant 0 : i32
    %c0_i32_0 = arith.constant 0 : i32
    return %c0_i32, %arg0 : i32, i32
  }
  func.func @transform_2(%arg0: i32) -> (i32, i32) {
    %c0_i32 = arith.constant 0 : i32
    %c0_i32_0 = arith.constant 0 : i32
    %c0_i32_1 = arith.constant 0 : i32
    return %c0_i32, %c0_i32_0 : i32, i32
  }
  func.func @transform_3(%arg0: i32) -> (i32, i32) {
    %c0_i32 = arith.constant 0 : i32
    %c0_i32_0 = arith.constant 0 : i32
    %c0_i32_1 = arith.constant 0 : i32
    return %c0_i32, %c0_i32_0 : i32, i32
  }
  func.func @transform_4(%arg0: i32) -> (i32, i32) {
    %c0_i32 = arith.constant 0 : i32
    %c0_i32_0 = arith.constant 0 : i32
    %c0_i32_1 = arith.constant 0 : i32
    return %c0_i32, %c0_i32_0 : i32, i32
  }
  func.func @transform_5(%arg0: i32) -> (i32, i32) {
    %c0_i32 = arith.constant 0 : i32
    %c0_i32_0 = arith.constant 0 : i32
    %c0_i32_1 = arith.constant 0 : i32
    return %c0_i32, %c0_i32_0 : i32, i32
  }
  func.func @transform_6(%arg0: i32) -> (i32, i32) {
    %c0_i32 = arith.constant 0 : i32
    %c0_i32_0 = arith.constant 0 : i32
    %c0_i32_1 = arith.constant 0 : i32
    return %c0_i32, %c0_i32_0 : i32, i32
  }
  func.func @transform_7(%arg0: i32) -> (i32, i32) {
    %c0_i32 = arith.constant 0 : i32
    %c0_i32_0 = arith.constant 0 : i32
    %c0_i32_1 = arith.constant 0 : i32
    return %c0_i32, %c0_i32_0 : i32, i32
  }
  func.func @transform_8(%arg0: i32) -> (i32, i32) {
    %c0_i32 = arith.constant 0 : i32
    %c0_i32_0 = arith.constant 0 : i32
    return %c0_i32, %arg0 : i32, i32
  }
}

</mosaic_0001>

<bundles_post_ra>
// kernel: tpu_custom_call.1
= control target key start
LH: loop header
LB: loop body
LE: loop exit
PB: predicated region body
PF: predicated region fallthrough
CT: control target
= control target key end

     0   :  { %vm286_vm0 = vcmask 130048   ;;  %v1948_v4 = vmov 0   ;;  %s3558_s0 = inlined_call_operand.vmem [shape: f32[256,16], index: 0, kind: input, shape index: {}]   ;;  %s3559_s1 = inlined_call_operand.vmem [shape: f32[4,256], index: 1, kind: input, shape index: {}]   ;;  %s3560_s2 = inlined_call_operand.vmem [shape: f32[256,16], index: 2, kind: input, shape index: {}]   ;;  %s3561_s3 = inlined_call_operand.vmem [shape: f32[256,1], index: 3, kind: input, shape index: {}]   ;;  %s3562_s4 = inlined_call_operand.vmem [shape: f32[256,256], index: 4, kind: input, shape index: {}]   ;;  %s3563_s5 = inlined_call_operand.vmem [shape: f32[256,1], index: 5, kind: input, shape index: {}]   ;;  %s3564_s6 = inlined_call_operand.vmem [shape: f32[8,256], index: 6, kind: input, shape index: {}]   ;;  %s3565_s7 = inlined_call_operand.vmem [shape: f32[8,1], index: 7, kind: input, shape index: {}]   ;;  %s3566_s8 = inlined_call_operand.hbm [shape: f32[5,256], index: 8, kind: output, shape index: {}]  }
   0x1   :  { %v45_v0 = vld [vmem:[%s3558_s0 + $0x78] sm:$0xff]  ;;  %v44_v2 = vld [vmem:[%s3558_s0 + $0x70] sm:$0xff]  ;;  %1895 = vset.pattern.permute.xlu0 %v1948_v4  ;;  %1897 = vset.pattern.permute.xlu2 %v1948_v4  ;;  %v43_v8 = vld [vmem:[%s3558_s0 + $0x68] sm:$0xff] }
   0x2   :  { %v61_v1 = vld [vmem:[%s3558_s0 + $0xf8] sm:$0xff]  ;;  %1761 = vmatpush.xpose.msk.msra.mxu0 %vm286_vm0, %v45_v0  ;;  %v60_v3 = vld [vmem:[%s3558_s0 + $0xf0] sm:$0xff]  ;;  %1896 = vset.pattern.permute.xlu1 %v1948_v4  ;;  %v59_v9 = vld [vmem:[%s3558_s0 + $0xe8] sm:$0xff] }
   0x3   :  { %1809 = vmatpush.xpose.msk.msra.mxu1 %vm286_vm0, %v61_v1  ;;  %v109_v5 = vld [vmem:[%s3561_s3 + $0x78] sm:$0xff]  ;;  %v124_v7 = vld [vmem:[%s3561_s3 + $0xf0] sm:$0xff]  ;;  %v42_v11 = vld [vmem:[%s3558_s0 + $0x60] sm:$0xff] }
   0x4   :  { %203 = vperm.xlu0 %1895, %v109_v5   ;;  %v125_v6 = vld [vmem:[%s3561_s3 + $0xf8] sm:$0xff]  ;;  %278 = vperm.xlu2 %1897, %v124_v7   ;;  %v108_v10 = vld [vmem:[%s3561_s3 + $0x70] sm:$0xff]  ;;  %v58_v12 = vld [vmem:[%s3558_s0 + $0xe0] sm:$0xff] }
   0x5   :  { %283 = vperm.xlu1 %1896, %v125_v6   ;;  %v107_v13 = vld [vmem:[%s3561_s3 + $0x68] sm:$0xff]  ;;  %v106_v14 = vld [vmem:[%s3561_s3 + $0x60] sm:$0xff] }
   0x6   :  { %1762 = vmatpush.xpose.msk.msra.mxu0 %vm286_vm0, %v44_v2 }
   0x7   :  { %1810 = vmatpush.xpose.msk.msra.mxu1 %vm286_vm0, %v60_v3 }
   0xa   :  { %1763 = vmatpush.xpose.msk.msra.mxu0 %vm286_vm0, %v43_v8 }
   0xb   :  { %1811 = vmatpush.xpose.msk.msra.mxu1 %vm286_vm0, %v59_v9 }
   0xc   :  { %198 = vperm.xlu0 %1895, %v108_v10  }
   0xd   :  { %13 = vsyncpa [#allocation3], 0  ;;  %v41_v15 = vld [vmem:[%s3558_s0 + $0x58] sm:$0xff]  ;;  %193 = vperm.xlu1 %1896, %v107_v13   ;;  %188 = vperm.xlu2 %1897, %v106_v14   ;;  %v123_v17 = vld [vmem:[%s3561_s3 + $0xe8] sm:$0xff]  ;;  %vm1722_vm3 = vcmask 1043456  }
   0xe   :  { %1764 = vmatpush.xpose.msk.msra.mxu0 %vm286_vm0, %v42_v11  ;;  %v57_v16 = vld [vmem:[%s3558_s0 + $0xd8] sm:$0xff]  ;;  %v40_v18 = vld [vmem:[%s3558_s0 + $0x50] sm:$0xff]  ;;  %v122_v20 = vld [vmem:[%s3561_s3 + $0xe0] sm:$0xff] }
   0xf   :  { %1812 = vmatpush.xpose.msk.msra.mxu1 %vm286_vm0, %v58_v12  ;;  %v56_v19 = vld [vmem:[%s3558_s0 + $0xd0] sm:$0xff]  ;;  %v105_v21 = vld [vmem:[%s3561_s3 + $0x58] sm:$0xff]  ;;  %v39_v22 = vld [vmem:[%s3558_s0 + $0x48] sm:$0xff] }
  0x10   :  { %v55_v23 = vld [vmem:[%s3558_s0 + $0xc8] sm:$0xff]  ;;  %v104_v24 = vld [vmem:[%s3561_s3 + $0x50] sm:$0xff]  ;;  %v38_v25 = vld [vmem:[%s3558_s0 + $0x40] sm:$0xff] }
  0x11   :  { %v54_v26 = vld [vmem:[%s3558_s0 + $0xc0] sm:$0xff]  ;;  %v121_v27 = vld [vmem:[%s3561_s3 + $0xd8] sm:$0xff]  ;;  %v103_v28 = vld [vmem:[%s3561_s3 + $0x48] sm:$0xff] }
  0x12   :  { %1765 = vmatpush.xpose.msk.msra.mxu0 %vm286_vm0, %v41_v15  ;;  %v37_v29 = vld [vmem:[%s3558_s0 + $0x38] sm:$0xff]  ;;  %v120_v31 = vld [vmem:[%s3561_s3 + $0xd0] sm:$0xff]  ;;  %v119_v34 = vld [vmem:[%s3561_s3 + $0xc8] sm:$0xff] }
  0x13   :  { %1813 = vmatpush.xpose.msk.msra.mxu1 %vm286_vm0, %v57_v16  ;;  %v53_v30 = vld [vmem:[%s3558_s0 + $0xb8] sm:$0xff]  ;;  %v36_v32 = vld [vmem:[%s3558_s0 + $0x30] sm:$0xff]  ;;  %v102_v35 = vld [vmem:[%s3561_s3 + $0x40] sm:$0xff] }
  0x14   :  { %273 = vperm.xlu0 %1895, %v123_v17   ;;  %v52_v33 = vld [vmem:[%s3558_s0 + $0xb0] sm:$0xff]  ;;  %v35_v36 = vld [vmem:[%s3558_s0 + $0x28] sm:$0xff]  ;;  %v101_v38 = vld [vmem:[%s3561_s3 + $0x38] sm:$0xff] }
  0x15   :  { %268 = vperm.xlu2 %1897, %v122_v20   ;;  %183 = vperm.xlu1 %1896, %v105_v21   ;;  %v51_v37 = vld [vmem:[%s3558_s0 + $0xa8] sm:$0xff]  ;;  %v34_v39 = vld [vmem:[%s3558_s0 + $0x20] sm:$0xff]  ;;  %v100_v42 = vld [vmem:[%s3561_s3 + $0x30] sm:$0xff] }
  0x16   :  { %1766 = vmatpush.xpose.msk.msra.mxu0 %vm286_vm0, %v40_v18  ;;  %v50_v40 = vld [vmem:[%s3558_s0 + $0xa0] sm:$0xff]  ;;  %v33_v43 = vld [vmem:[%s3558_s0 + $0x18] sm:$0xff]  ;;  %v32_v46 = vld [vmem:[%s3558_s0 + $0x10] sm:$0xff] }
  0x17   :  { %1814 = vmatpush.xpose.msk.msra.mxu1 %vm286_vm0, %v56_v19  ;;  %v118_v41 = vld [vmem:[%s3561_s3 + $0xc0] sm:$0xff]  ;;  %v49_v44 = vld [vmem:[%s3558_s0 + $0x98] sm:$0xff]  ;;  %v48_v47 = vld [vmem:[%s3558_s0 + $0x90] sm:$0xff] }
  0x18   :  { %v117_v45 = vld [vmem:[%s3561_s3 + $0xb8] sm:$0xff]  ;;  %v116_v48 = vld [vmem:[%s3561_s3 + $0xb0] sm:$0xff]  ;;  %v99_v49 = vld [vmem:[%s3561_s3 + $0x28] sm:$0xff] }
  0x19   :  { %v31_v50 = vld [vmem:[%s3558_s0 + $0x8] sm:$0xff]  ;;  %v98_v52 = vld [vmem:[%s3561_s3 + $0x20] sm:$0xff]  ;;  %v97_v56 = vld [vmem:[%s3561_s3 + $0x18] sm:$0xff] }
  0x1a   :  { %1767 = vmatpush.xpose.msk.msra.mxu0 %vm286_vm0, %v39_v22  ;;  %v47_v51 = vld [vmem:[%s3558_s0 + $0x88] sm:$0xff]  ;;  %v30_v53 = vld [vmem:[%s3558_s0] sm:$0xff]  ;;  %v113_v59 = vld [vmem:[%s3561_s3 + $0x98] sm:$0xff] }
  0x1b   :  { %1815 = vmatpush.xpose.msk.msra.mxu1 %vm286_vm0, %v55_v23  ;;  %v46_v54 = vld [vmem:[%s3558_s0 + $0x80] sm:$0xff]  ;;  %v115_v55 = vld [vmem:[%s3561_s3 + $0xa8] sm:$0xff]  ;;  %v96_v60 = vld [vmem:[%s3561_s3 + $0x10] sm:$0xff] }
  0x1c   :  { %178 = vperm.xlu0 %1895, %v104_v24   ;;  %v62_v57 = vld [vmem:[%s3560_s2] sm:$0xff]  ;;  %v63_v61 = vld [vmem:[%s3560_s2 + $0x8] sm:$0xff]  ;;  %v64_v0 = vld [vmem:[%s3560_s2 + $0x10] sm:$0xff] }
  0x1d   :  { %263 = vperm.xlu1 %1896, %v121_v27   ;;  %173 = vperm.xlu2 %1897, %v103_v28   ;;  %v114_v58 = vld [vmem:[%s3561_s3 + $0xa0] sm:$0xff]  ;;  %v95_v62 = vld [vmem:[%s3561_s3 + $0x8] sm:$0xff]  ;;  %v65_v1 = vld [vmem:[%s3560_s2 + $0x18] sm:$0xff] }
  0x1e   :  { %1768 = vmatpush.xpose.msk.msra.mxu0 %vm286_vm0, %v38_v25  ;;  %v94_v63 = vld [vmem:[%s3561_s3] sm:$0xff]  ;;  %v67_v3 = vld [vmem:[%s3560_s2 + $0x28] sm:$0xff]  ;;  %v68_v4 = vld [vmem:[%s3560_s2 + $0x30] sm:$0xff] }
  0x1f   :  { %1816 = vmatpush.xpose.msk.msra.mxu1 %vm286_vm0, %v54_v26  ;;  %v66_v2 = vld [vmem:[%s3560_s2 + $0x20] sm:$0xff]  ;;  %v69_v5 = vld [vmem:[%s3560_s2 + $0x38] sm:$0xff]  ;;  %v71_v7 = vld [vmem:[%s3560_s2 + $0x48] sm:$0xff] }
  0x20   :  { %v70_v6 = vld [vmem:[%s3560_s2 + $0x40] sm:$0xff]  ;;  %v72_v8 = vld [vmem:[%s3560_s2 + $0x50] sm:$0xff]  ;;  %v111_v10 = vld [vmem:[%s3561_s3 + $0x88] sm:$0xff] }
  0x21   :  { %v112_v9 = vld [vmem:[%s3561_s3 + $0x90] sm:$0xff]  ;;  %v73_v11 = vld [vmem:[%s3560_s2 + $0x58] sm:$0xff]  ;;  %v110_v12 = vld [vmem:[%s3561_s3 + $0x80] sm:$0xff] }
  0x22   :  { %1769 = vmatpush.xpose.msk.msra.mxu0 %vm286_vm0, %v37_v29  ;;  %v74_v13 = vld [vmem:[%s3560_s2 + $0x60] sm:$0xff]  ;;  %v847_v14 = vld [vmem:[%s3563_s5 + $0x70] sm:$0xff]  ;;  %v864_v15 = vld [vmem:[%s3563_s5 + $0xf8] sm:$0xff] }
  0x23   :  { %1817 = vmatpush.xpose.msk.msra.mxu1 %vm286_vm0, %v53_v30  ;;  %v75_v16 = vld [vmem:[%s3560_s2 + $0x68] sm:$0xff]  ;;  %v863_v17 = vld [vmem:[%s3563_s5 + $0xf0] sm:$0xff]  ;;  %v845_v18 = vld [vmem:[%s3563_s5 + $0x60] sm:$0xff] }
  0x24   :  { %258 = vperm.xlu0 %1895, %v120_v31   ;;  %v76_v19 = vld [vmem:[%s3560_s2 + $0x70] sm:$0xff]  ;;  %v844_v20 = vld [vmem:[%s3563_s5 + $0x58] sm:$0xff]  ;;  %v861_v21 = vld [vmem:[%s3563_s5 + $0xe0] sm:$0xff] }
  0x25   :  { %253 = vperm.xlu2 %1897, %v119_v34   ;;  %168 = vperm.xlu1 %1896, %v102_v35   ;;  %v77_v22 = vld [vmem:[%s3560_s2 + $0x78] sm:$0xff]  ;;  %v842_v24 = vld [vmem:[%s3563_s5 + $0x48] sm:$0xff]  ;;  %v78_v27 = vld [vmem:[%s3560_s2 + $0x80] sm:$0xff] }
  0x26   :  { %1770 = vmatpush.xpose.msk.msra.mxu0 %vm286_vm0, %v36_v32  ;;  %v860_v23 = vld [vmem:[%s3563_s5 + $0xd8] sm:$0xff]  ;;  %v841_v28 = vld [vmem:[%s3563_s5 + $0x40] sm:$0xff]  ;;  %v858_v30 = vld [vmem:[%s3563_s5 + $0xc8] sm:$0xff] }
  0x27   :  { %1818 = vmatpush.xpose.msk.msra.mxu1 %vm286_vm0, %v52_v33  ;;  %v848_v29 = vld [vmem:[%s3563_s5 + $0x78] sm:$0xff]  ;;  %v79_v33 = vld [vmem:[%s3560_s2 + $0x88] sm:$0xff]  ;;  %v857_v34 = vld [vmem:[%s3563_s5 + $0xc0] sm:$0xff] }
  0x28   :  { %v846_v35 = vld [vmem:[%s3563_s5 + $0x68] sm:$0xff] }
  0x2a   :  { %1771 = vmatpush.xpose.msk.msra.mxu0 %vm286_vm0, %v35_v36  ;;  %v839_v36 = vld [vmem:[%s3563_s5 + $0x30] sm:$0xff] }
  0x2b   :  { %1819 = vmatpush.xpose.msk.msra.mxu1 %vm286_vm0, %v51_v37 }
  0x2c   :  { %163 = vperm.xlu0 %1895, %v101_v38  }
  0x2d   :  { %248 = vperm.xlu1 %1896, %v118_v41   ;;  %158 = vperm.xlu2 %1897, %v100_v42   ;;  %v862_v41 = vld [vmem:[%s3563_s5 + $0xe8] sm:$0xff]  ;;  %v855_v42 = vld [vmem:[%s3563_s5 + $0xb0] sm:$0xff] }
  0x2e   :  { %1772 = vmatpush.xpose.msk.msra.mxu0 %vm286_vm0, %v34_v39  ;;  %v80_v39 = vld [vmem:[%s3560_s2 + $0x90] sm:$0xff] }
  0x2f   :  { %1820 = vmatpush.xpose.msk.msra.mxu1 %vm286_vm0, %v50_v40  ;;  %v838_v40 = vld [vmem:[%s3563_s5 + $0x28] sm:$0xff] }
  0x32   :  { %1773 = vmatpush.xpose.msk.msra.mxu0 %vm286_vm0, %v33_v43 }
  0x33   :  { %1821 = vmatpush.xpose.msk.msra.mxu1 %vm286_vm0, %v49_v44 }
  0x34   :  { %243 = vperm.xlu0 %1895, %v117_v45   ;;  %v81_v45 = vld [vmem:[%s3560_s2 + $0x98] sm:$0xff] }
  0x35   :  { %238 = vperm.xlu2 %1897, %v116_v48   ;;  %153 = vperm.xlu1 %1896, %v99_v49   ;;  %v836_v48 = vld [vmem:[%s3563_s5 + $0x18] sm:$0xff] }
  0x36   :  { %1774 = vmatpush.xpose.msk.msra.mxu0 %vm286_vm0, %v32_v46  ;;  %v854_v46 = vld [vmem:[%s3563_s5 + $0xa8] sm:$0xff] }
  0x37   :  { %1822 = vmatpush.xpose.msk.msra.mxu1 %vm286_vm0, %v48_v47  ;;  %v843_v47 = vld [vmem:[%s3563_s5 + $0x50] sm:$0xff] }
  0x3a   :  { %1775 = vmatpush.xpose.msk.msra.mxu0 %vm286_vm0, %v31_v50 }
  0x3b   :  { %1823 = vmatpush.xpose.msk.msra.mxu1 %vm286_vm0, %v47_v51  ;;  %v82_v51 = vld [vmem:[%s3560_s2 + $0xa0] sm:$0xff] }
  0x3c   :  { %148 = vperm.xlu0 %1895, %v98_v52   ;;  %v835_v52 = vld [vmem:[%s3563_s5 + $0x10] sm:$0xff] }
  0x3d   :  { %233 = vperm.xlu1 %1896, %v115_v55   ;;  %143 = vperm.xlu2 %1897, %v97_v56  }
  0x3e   :  { %1776 = vmatpush.xpose.msk.msra.mxu0 %vm286_vm0, %v30_v53  ;;  %v859_v53 = vld [vmem:[%s3563_s5 + $0xd0] sm:$0xff] }
  0x3f   :  { %1824 = vmatpush.xpose.msk.msra.mxu1 %vm286_vm0, %v46_v54  ;;  %v852_v54 = vld [vmem:[%s3563_s5 + $0x98] sm:$0xff] }
  0x41   :  { %1777 = vmatmul.msk.f32.vlgmr.msra.gmra.mxu0 %vm286_vm0, %v62_v57 }
  0x42   :  { %1825 = vmatmul.msk.f32.vlgmr.msra.gmra.mxu1 %vm286_vm0, %v62_v57  ;;  %v83_v57 = vld [vmem:[%s3560_s2 + $0xa8] sm:$0xff] }
  0x44   :  { %228 = vperm.xlu0 %1895, %v114_v58   ;;  %v851_v58 = vld [vmem:[%s3563_s5 + $0x90] sm:$0xff] }
  0x45   :  { %223 = vperm.xlu2 %1897, %v113_v59   ;;  %138 = vperm.xlu1 %1896, %v96_v60   ;;  %v840_v59 = vld [vmem:[%s3563_s5 + $0x38] sm:$0xff]  ;;  %v833_v60 = vld [vmem:[%s3563_s5] sm:$0xff] }
  0x49   :  { %1778 = vmatmul.msk.f32.gmra.mxu0 %vm286_vm0, %v63_v61 }
  0x4a   :  { %1826 = vmatmul.msk.f32.gmra.mxu1 %vm286_vm0, %v63_v61 }
  0x4c   :  { %133 = vperm.xlu0 %1895, %v95_v62  }
  0x4d   :  { %128 = vperm.xlu2 %1897, %v94_v63   ;;  %218 = vperm.xlu1 %1896, %v112_v9   ;;  %v84_v63 = vld [vmem:[%s3560_s2 + $0xb0] sm:$0xff] }
  0x51   :  { %1779 = vmatmul.msk.f32.gmra.mxu0 %vm286_vm0, %v64_v0 }
  0x52   :  { %1827 = vmatmul.msk.f32.gmra.mxu1 %vm286_vm0, %v64_v0  ;;  %v849_v0 = vld [vmem:[%s3563_s5 + $0x80] sm:$0xff] }
  0x54   :  { %213 = vperm.xlu0 %1895, %v111_v10  }
  0x55   :  { %208 = vperm.xlu1 %1896, %v110_v12   ;;  %942 = vperm.xlu2 %1897, %v848_v29   ;;  %v850_v29 = vld [vmem:[%s3563_s5 + $0x88] sm:$0xff] }
  0x59   :  { %1780 = vmatmul.msk.f32.gmra.mxu0 %vm286_vm0, %v65_v1 }
  0x5a   :  { %1828 = vmatmul.msk.f32.gmra.mxu1 %vm286_vm0, %v65_v1  ;;  %v856_v1 = vld [vmem:[%s3563_s5 + $0xb8] sm:$0xff] }
  0x5c   :  { %937 = vperm.xlu0 %1895, %v847_v14  }
  0x5d   :  { %1022 = vperm.xlu1 %1896, %v864_v15   ;;  %932 = vperm.xlu2 %1897, %v846_v35   ;;  %v853_v15 = vld [vmem:[%s3563_s5 + $0xa0] sm:$0xff] }
  0x61   :  { %1781 = vmatmul.msk.f32.gmra.mxu0 %vm286_vm0, %v66_v2 }
  0x62   :  { %1829 = vmatmul.msk.f32.gmra.mxu1 %vm286_vm0, %v66_v2  ;;  %v1543_v2 = vld [vmem:[%s3565_s7] sm:$0xff] }
  0x64   :  { %1017 = vperm.xlu0 %1895, %v863_v17  }
  0x65   :  { %927 = vperm.xlu1 %1896, %v845_v18   ;;  %1012 = vperm.xlu2 %1897, %v862_v41  }
  0x69   :  { %1782 = vmatmul.msk.f32.gmra.mxu0 %vm286_vm0, %v67_v3 }
  0x6a   :  { %1830 = vmatmul.msk.f32.gmra.mxu1 %vm286_vm0, %v67_v3 }
  0x6c   :  { %922 = vperm.xlu0 %1895, %v844_v20  }
  0x6d   :  { %1007 = vperm.xlu1 %1896, %v861_v21   ;;  %917 = vperm.xlu2 %1897, %v843_v47   ;;  %v834_v21 = vld [vmem:[%s3563_s5 + $0x8] sm:$0xff] }
  0x71   :  { %1783 = vmatmul.msk.f32.gmra.mxu0 %vm286_vm0, %v68_v4 }
  0x72   :  { %1831 = vmatmul.msk.f32.gmra.mxu1 %vm286_vm0, %v68_v4  ;;  %v2451_v4 = vpop.permute.xlu2 %278 }
  0x74   :  { %1002 = vperm.xlu0 %1895, %v860_v23  }
  0x75   :  { %912 = vperm.xlu1 %1896, %v842_v24   ;;  %997 = vperm.xlu2 %1897, %v859_v53   ;;  %v91_v53 = vld [vmem:[%s3560_s2 + $0xe8] sm:$0xff] }
  0x76   :  { %v2449_v3 = vpop.permute.xlu0 %203 }
  0x77   :  { %v2465_v9 = vpop.permute.xlu1 %283 }
  0x79   :  { %1784 = vmatmul.msk.f32.gmra.mxu0 %vm286_vm0, %v69_v5 }
  0x7a   :  { %1832 = vmatmul.msk.f32.gmra.mxu1 %vm286_vm0, %v69_v5  ;;  %v2476_v14 = vpop.permute.xlu2 %188 }
  0x7c   :  { %907 = vperm.xlu0 %1895, %v841_v28  }
  0x7d   :  { %992 = vperm.xlu1 %1896, %v858_v30   ;;  %902 = vperm.xlu2 %1897, %v840_v59  }
  0x7e   :  { %v2467_v10 = vpop.permute.xlu0 %198 }
  0x81   :  { %1785 = vmatmul.msk.f32.gmra.mxu0 %vm286_vm0, %v70_v6 }
  0x82   :  { %1833 = vmatmul.msk.f32.gmra.mxu1 %vm286_vm0, %v70_v6 }
  0x84   :  { %987 = vperm.xlu0 %1895, %v857_v34  }
  0x85   :  { %897 = vperm.xlu1 %1896, %v839_v36   ;;  %982 = vperm.xlu2 %1897, %v856_v1   ;;  %v89_v36 = vld [vmem:[%s3560_s2 + $0xd8] sm:$0xff] }
  0x86   :  { %v2492_v20 = vpop.permute.xlu0 %273 }
  0x89   :  { %1786 = vmatmul.msk.f32.gmra.mxu0 %vm286_vm0, %v71_v7 }
  0x8a   :  { %1834 = vmatmul.msk.f32.gmra.mxu1 %vm286_vm0, %v71_v7  ;;  %v85_v7 = vld [vmem:[%s3560_s2 + $0xb8] sm:$0xff] }
  0x8c   :  { %892 = vperm.xlu0 %1895, %v838_v40  }
  0x8d   :  { %977 = vperm.xlu1 %1896, %v855_v42  }
  0x8e   :  { %v2511_v30 = vpop.permute.xlu0 %178 }
  0x91   :  { %1787 = vmatmul.msk.f32.gmra.mxu0 %vm286_vm0, %v72_v8 }
  0x92   :  { %1835 = vmatmul.msk.f32.gmra.mxu1 %vm286_vm0, %v72_v8  ;;  %v837_v8 = vld [vmem:[%s3563_s5 + $0x20] sm:$0xff] }
  0x93   :  { %887 = vperm.xlu2 %1897, %v837_v8  }
  0x94   :  { %972 = vperm.xlu0 %1895, %v854_v46   ;;  %v90_v46 = vld [vmem:[%s3560_s2 + $0xe0] sm:$0xff] }
  0x95   :  { %882 = vperm.xlu1 %1896, %v836_v48  }
  0x96   :  { %v2526_v40 = vpop.permute.xlu0 %258 }
  0x99   :  { %1788 = vmatmul.msk.f32.gmra.mxu0 %vm286_vm0, %v73_v11 }
  0x9a   :  { %1836 = vmatmul.msk.f32.gmra.mxu1 %vm286_vm0, %v73_v11 }
  0x9b   :  { %967 = vperm.xlu2 %1897, %v853_v15  }
  0x9c   :  { %877 = vperm.xlu0 %1895, %v835_v52  }
  0x9d   :  { %962 = vperm.xlu1 %1896, %v852_v54  }
  0x9e   :  { %v2539_v48 = vpop.permute.xlu0 %163 }
  0xa1   :  { %1789 = vmatmul.msk.f32.gmra.mxu0 %vm286_vm0, %v74_v13 }
  0xa2   :  { %1837 = vmatmul.msk.f32.gmra.mxu1 %vm286_vm0, %v74_v13  ;;  %v86_v13 = vld [vmem:[%s3560_s2 + $0xc0] sm:$0xff] }
  0xa3   :  { %872 = vperm.xlu2 %1897, %v834_v21  }
  0xa4   :  { %957 = vperm.xlu0 %1895, %v851_v58  }
  0xa5   :  { %867 = vperm.xlu1 %1896, %v833_v60   ;;  %v92_v60 = vld [vmem:[%s3560_s2 + $0xf0] sm:$0xff] }
  0xa9   :  { %1790 = vmatmul.msk.f32.gmra.mxu0 %vm286_vm0, %v75_v16 }
  0xaa   :  { %1838 = vmatmul.msk.f32.gmra.mxu1 %vm286_vm0, %v75_v16  ;;  %v2483_v16 = vpop.permute.xlu1 %193 }
  0xab   :  { %952 = vperm.xlu2 %1897, %v850_v29  }
  0xac   :  { %947 = vperm.xlu0 %1895, %v849_v0  }
  0xad   :  { %1546 = vperm.xlu1 %1896, %v1543_v2  }
  0xb1   :  { %1791 = vmatmul.msk.f32.gmra.mxu0 %vm286_vm0, %v76_v19 }
  0xb2   :  { %1839 = vmatmul.msk.f32.gmra.mxu1 %vm286_vm0, %v76_v19  ;;  %v87_v19 = vld [vmem:[%s3560_s2 + $0xc8] sm:$0xff]  ;;  %v2506_v28 = vpop.permute.xlu1 %183 }
  0xb9   :  { %1792 = vmatmul.msk.f32.gmra.mxu0 %vm286_vm0, %v77_v22 }
  0xba   :  { %1840 = vmatmul.msk.f32.gmra.mxu1 %vm286_vm0, %v77_v22  ;;  %v2497_v22 = vpop.permute.xlu2 %268 }
  0xbe   :  { %v2323_v25 = vpop.f32.mrf.mxu0 }
  0xbf   :  { %v2325_v26 = vpop.f32.mrf.mxu1 }
  0xc1   :  { %1793 = vmatmul.msk.f32.gmra.mxu0 %vm286_vm0, %v78_v27 }
  0xc2   :  { %1841 = vmatmul.msk.f32.gmra.mxu1 %vm286_vm0, %v78_v27  ;;  %v88_v27 = vld [vmem:[%s3560_s2 + $0xd0] sm:$0xff] }
  0xc6   :  { %v2341_v31 = vpop.f32.mrf.mxu0 }
  0xc7   :  { %v2343_v32 = vpop.f32.mrf.mxu1 }
  0xc9   :  { %1794 = vmatmul.msk.f32.gmra.mxu0 %vm286_vm0, %v79_v33 }
  0xca   :  { %1842 = vmatmul.msk.f32.gmra.mxu1 %vm286_vm0, %v79_v33  ;;  %v2515_v33 = vpop.permute.xlu2 %173 }
  0xce   :  { %v2359_v37 = vpop.f32.mrf.mxu0 }
  0xcf   :  { %v2361_v38 = vpop.f32.mrf.mxu1 }
  0xd1   :  { %1795 = vmatmul.msk.f32.gmra.mxu0 %vm286_vm0, %v80_v39 }
  0xd2   :  { %1843 = vmatmul.msk.f32.gmra.mxu1 %vm286_vm0, %v80_v39  ;;  %v2522_v39 = vpop.permute.xlu1 %263  ;;  %v2528_v41 = vpop.permute.xlu2 %253 }
  0xd6   :  { %v2377_v43 = vpop.f32.mrf.mxu0 }
  0xd7   :  { %v2379_v44 = vpop.f32.mrf.mxu1 }
  0xd9   :  { %1796 = vmatmul.msk.f32.gmra.mxu0 %vm286_vm0, %v81_v45 }
  0xda   :  { %1844 = vmatmul.msk.f32.gmra.mxu1 %vm286_vm0, %v81_v45  ;;  %v2537_v47 = vpop.permute.xlu1 %168  ;;  %v2546_v54 = vpop.permute.xlu2 %158 }
  0xde   :  { %v2395_v49 = vpop.f32.mrf.mxu0 }
  0xdf   :  { %v2397_v50 = vpop.f32.mrf.mxu1 }
  0xe1   :  { %1797 = vmatmul.msk.f32.gmra.mxu0 %vm286_vm0, %v82_v51 }
  0xe2   :  { %1845 = vmatmul.msk.f32.gmra.mxu1 %vm286_vm0, %v82_v51  ;;  %v2561_v0 = vpop.permute.xlu2 %238 }
  0xe6   :  { %v2413_v55 = vpop.f32.mrf.mxu0 }
  0xe7   :  { %v2415_v56 = vpop.f32.mrf.mxu1 }
  0xe9   :  { %1798 = vmatmul.msk.f32.gmra.mxu0 %vm286_vm0, %v83_v57 }
  0xea   :  { %1846 = vmatmul.msk.f32.gmra.mxu1 %vm286_vm0, %v83_v57  ;;  %v2550_v57 = vpop.permute.xlu1 %248 }
  0xee   :  { %v2431_v61 = vpop.f32.mrf.mxu0 }
  0xef   :  { %v2433_v62 = vpop.f32.mrf.mxu1 }
  0xf1   :  { %1799 = vmatmul.msk.f32.gmra.mxu0 %vm286_vm0, %v84_v63 }
  0xf2   :  { %1847 = vmatmul.msk.f32.gmra.mxu1 %vm286_vm0, %v84_v63  ;;  %v2557_v63 = vpop.permute.xlu0 %243  ;;  %v2570_v15 = vpop.permute.xlu1 %153 }
  0xf6   :  { %v2453_v5 = vpop.f32.mrf.mxu0 }
  0xf7   :  { %v2455_v6 = vpop.f32.mrf.mxu1 }
  0xf9   :  { %1800 = vmatmul.msk.f32.gmra.mxu0 %vm286_vm0, %v85_v7 }
  0xfa   :  { %1848 = vmatmul.msk.f32.gmra.mxu1 %vm286_vm0, %v85_v7  ;;  %v93_v7 = vld [vmem:[%s3560_s2 + $0xf8] sm:$0xff]  ;;  %s1752_s2 = sshll.u32 %s3566_s8, 4  ;;  %s1753_s2 = int_to_ptr.hbm [resolvable:$true] %s1752_s2 }
  0xfe   :  { %v2469_v11 = vpop.f32.mrf.mxu0 }
  0xff   :  { %v2471_v12 = vpop.f32.mrf.mxu1 }
 0x101   :  { %1801 = vmatmul.msk.f32.gmra.mxu0 %vm286_vm0, %v86_v13 }
 0x102   :  { %1849 = vmatmul.msk.f32.gmra.mxu1 %vm286_vm0, %v86_v13 }
 0x106   :  { %v2485_v17 = vpop.f32.mrf.mxu0 }
 0x107   :  { %v2487_v18 = vpop.f32.mrf.mxu1 }
 0x109   :  { %1802 = vmatmul.msk.f32.gmra.mxu0 %vm286_vm0, %v87_v19 }
 0x10a   :  { %1850 = vmatmul.msk.f32.gmra.mxu1 %vm286_vm0, %v87_v19 }
 0x10e   :  { %v526_v23 = vpop.f32.mrf.mxu0 }
 0x10f   :  { %v2501_v24 = vpop.f32.mrf.mxu1 }
 0x111   :  { %1803 = vmatmul.msk.f32.gmra.mxu0 %vm286_vm0, %v88_v27 }
 0x112   :  { %1851 = vmatmul.msk.f32.gmra.mxu1 %vm286_vm0, %v88_v27  ;;  %v2575_v27 = vpop.permute.xlu0 %148 }
 0x116   :  { %v529_v34 = vpop.f32.mrf.mxu0 }
 0x117   :  { %v2517_v35 = vpop.f32.mrf.mxu1 }
 0x119   :  { %1804 = vmatmul.msk.f32.gmra.mxu0 %vm286_vm0, %v89_v36 }
 0x11a   :  { %1852 = vmatmul.msk.f32.gmra.mxu1 %vm286_vm0, %v89_v36 }
 0x11e   :  { %v532_v42 = vpop.f32.mrf.mxu0 }
 0x11f   :  { %v2530_v45 = vpop.f32.mrf.mxu1  ;;  %v533_v29 = vadd.f32 %v532_v42, %v2476_v14  ;;  %v524_v42 = vadd.f32 %v2485_v17, %v2515_v33 }
 0x121   :  { %1805 = vmatmul.msk.f32.gmra.mxu0 %vm286_vm0, %v90_v46 }
 0x122   :  { %1853 = vmatmul.msk.f32.gmra.mxu1 %vm286_vm0, %v90_v46  ;;  %v2578_v46 = vpop.permute.xlu2 %143 }
 0x126   :  { %v535_v51 = vpop.f32.mrf.mxu0 }
 0x127   :  { %v2541_v52 = vpop.f32.mrf.mxu1  ;;  %v536_v19 = vadd.f32 %v535_v51, %v2483_v16 }
 0x129   :  { %1806 = vmatmul.msk.f32.gmra.mxu0 %vm286_vm0, %v91_v53 }
 0x12a   :  { %1854 = vmatmul.msk.f32.gmra.mxu1 %vm286_vm0, %v91_v53  ;;  %v530_v53 = vadd.f32 %v529_v34, %v2506_v28  ;;  %v521_v34 = vadd.f32 %v2469_v11, %v2537_v47  ;;  %v2596_v17 = vpop.permute.xlu2 %223 }
 0x12c   :  { %v721_v11 = vmax.f32 %v521_v34, 0.0 }
 0x12e   :  { %v538_v58 = vpop.f32.mrf.mxu0 }
 0x12f   :  { %v2552_v59 = vpop.f32.mrf.mxu1  ;;  %v539_v8 = vadd.f32 %v538_v58, %v2467_v10  ;;  %v731_v58 = vmax.f32 %v536_v19, 0.0 }
 0x131   :  { %1807 = vmatmul.msk.f32.gmra.mxu0 %vm286_vm0, %v92_v60  ;;  %v733_v36 = vmax.f32 %v539_v8, 0.0  ;;  %v727_v8 = vmax.f32 %v530_v53, 0.0  ;;  %v515_v53 = vadd.f32 %v2431_v61, %v2546_v54  ;;  %v506_v61 = vadd.f32 %v2377_v43, %v2578_v46 }
 0x132   :  { %1855 = vmatmul.msk.f32.gmra.mxu1 %vm286_vm0, %v92_v60 }
 0x133   :  { %v711_v43 = vmax.f32 %v506_v61, 0.0  ;;  %v649_v61 = vadd.f32 %v2541_v52, %v2483_v16  ;;  %v643_v52 = vadd.f32 %v2517_v35, %v2506_v28  ;;  %v2666_v28 = vld [vmem:[%s3562_s4 + $0xc0] sm:$0xff] }
 0x134   :  { %3625 = vst [vmem:[#allocation5_spill] sm:$0xff] %v2666_v28 }
 0x135   :  { %v728_v35 = vmax.f32 %v643_v52, 0.0 }
 0x136   :  { %v541_v1 = vpop.f32.mrf.mxu0 }
 0x137   :  { %v2563_v2 = vpop.f32.mrf.mxu1  ;;  %v542_v13 = vadd.f32 %v541_v1, %v2449_v3  ;;  %v527_v1 = vadd.f32 %v526_v23, %v2511_v30  ;;  %v518_v23 = vadd.f32 %v2453_v5, %v2539_v48 }
 0x139   :  { %1808 = vmatmul.msk.f32.gmra.mxu0 %vm286_vm0, %v93_v7  ;;  %v735_v21 = vmax.f32 %v542_v13, 0.0  ;;  %v2588_v13 = vpop.permute.xlu1 %233  ;;  %v725_v19 = vmax.f32 %v527_v1, 0.0  ;;  %v512_v1 = vadd.f32 %v2413_v55, %v2570_v15  ;;  %v719_v5 = vmax.f32 %v518_v23, 0.0 }
 0x13a   :  { %1856 = vmatmul.msk.f32.gmra.mxu1 %vm286_vm0, %v93_v7  ;;  %v729_v7 = vmax.f32 %v533_v29, 0.0  ;;  %v723_v29 = vmax.f32 %v524_v42, 0.0  ;;  %v717_v42 = vmax.f32 %v515_v53, 0.0 }
 0x13b   :  { %1025 = vmatpush.msrb.mxu0 %v735_v21  ;;  %1861 = vmatpush.msra.mxu2 %v735_v21  ;;  %v2592_v21 = vpop.permute.xlu0 %228  ;;  %v715_v34 = vmax.f32 %v512_v1, 0.0 }
 0x13d   :  { %1026 = vmatpush.msrb.mxu0 %v733_v36  ;;  %1862 = vmatpush.msra.mxu2 %v733_v36 }
 0x13e   :  { %v2581_v51 = vpop.f32.mrf.mxu0 }
 0x13f   :  { %v2583_v60 = vpop.f32.mrf.mxu1  ;;  %1027 = vmatpush.msrb.mxu0 %v731_v58  ;;  %1863 = vmatpush.msra.mxu2 %v731_v58 }
 0x141   :  { %1028 = vmatpush.msrb.mxu0 %v729_v7  ;;  %1864 = vmatpush.msra.mxu2 %v729_v7  ;;  %v509_v7 = vadd.f32 %v2395_v49, %v2575_v27 }
 0x143   :  { %1029 = vmatpush.msrb.mxu0 %v727_v8  ;;  %1865 = vmatpush.msra.mxu2 %v727_v8  ;;  %v2608_v8 = vpop.permute.xlu1 %138  ;;  %v713_v49 = vmax.f32 %v509_v7, 0.0  ;;  %v652_v7 = vadd.f32 %v2552_v59, %v2467_v10  ;;  %v2642_v10 = vld [vmem:[%s3562_s4 + $0xb0] sm:$0xff] }
 0x144   :  { %v503_v23 = vadd.f32 %v2359_v37, %v2608_v8 }
 0x145   :  { %1030 = vmatpush.msrb.mxu0 %v725_v19  ;;  %1866 = vmatpush.msra.mxu2 %v725_v19  ;;  %v2612_v19 = vpop.permute.xlu0 %133  ;;  %v734_v16 = vmax.f32 %v652_v7, 0.0 }
 0x146   :  { %v2598_v36 = vpop.f32.mrf.mxu0  ;;  %v500_v53 = vadd.f32 %v2341_v31, %v2612_v19  ;;  %v709_v37 = vmax.f32 %v503_v23, 0.0  ;;  %v732_v23 = vmax.f32 %v649_v61, 0.0 }
 0x147   :  { %v2602_v58 = vpop.f32.mrf.mxu1  ;;  %1031 = vmatpush.msrb.mxu0 %v723_v29  ;;  %1867 = vmatpush.msra.mxu2 %v723_v29  ;;  %v2618_v29 = vpop.permute.xlu2 %128 }
 0x148   :  { %v497_v1 = vadd.f32 %v2323_v25, %v2618_v29  ;;  %v707_v31 = vmax.f32 %v500_v53, 0.0 }
 0x149   :  { %1032 = vmatpush.msrb.mxu0 %v721_v11  ;;  %1868 = vmatpush.msra.mxu2 %v721_v11 }
 0x14a   :  { %v705_v25 = vmax.f32 %v497_v1, 0.0  ;;  %v628_v1 = vadd.f32 %v2433_v62, %v2546_v54 }
 0x14b   :  { %1033 = vmatpush.msrb.mxu0 %v719_v5  ;;  %1869 = vmatpush.msra.mxu2 %v719_v5  ;;  %v655_v5 = vadd.f32 %v2563_v2, %v2449_v3  ;;  %v2637_v3 = vld [vmem:[%s3562_s4] sm:$0xff]  ;;  %v646_v2 = vadd.f32 %v2530_v45, %v2476_v14  ;;  %v637_v45 = vadd.f32 %v2487_v18, %v2515_v33 }
 0x14c   :  { %v631_v18 = vadd.f32 %v2455_v6, %v2539_v48  ;;  %v2690_v6 = vld [vmem:[%s3562_s4 + $0xd0] sm:$0xff]  ;;  %v622_v48 = vadd.f32 %v2397_v50, %v2575_v27  ;;  %v718_v54 = vmax.f32 %v628_v1, 0.0  ;;  %v2774_v1 = vld [vmem:[%s3562_s4 + $0x120] sm:$0xff] }
 0x14d   :  { %1034 = vmatpush.msrb.mxu0 %v717_v42  ;;  %1870 = vmatpush.msra.mxu2 %v717_v42  ;;  %v736_v59 = vmax.f32 %v655_v5, 0.0  ;;  %v730_v53 = vmax.f32 %v646_v2, 0.0  ;;  %v724_v33 = vmax.f32 %v637_v45, 0.0  ;;  %3626 = vst [vmem:[#allocation6_spill] sm:$0xff] %v2690_v6  ;;  %v2707_v50 = vld [vmem:[%s3562_s4 + $0x30] sm:$0xff] }
 0x14e   :  { %v2614_v55 = vpop.f32.mrf.mxu0  ;;  %v720_v62 = vmax.f32 %v631_v18, 0.0  ;;  %v714_v61 = vmax.f32 %v622_v48, 0.0  ;;  %3631 = vst [vmem:[#allocation11_spill] sm:$0xff] %v2774_v1  ;;  %v2788_v48 = vld [vmem:[%s3562_s4 + $0x130] sm:$0xff] }
 0x14f   :  { %1035 = vmatpush.msrb.mxu0 %v715_v34  ;;  %1871 = vmatpush.msra.mxu2 %v715_v34  ;;  %v2622_v11 = vpop.f32.mrf.mxu1  ;;  %3632 = vst [vmem:[#allocation12_spill] sm:$0xff] %v2788_v48 }
 0x151   :  { %1036 = vmatpush.msrb.mxu0 %v713_v49  ;;  %1872 = vmatpush.msra.mxu2 %v713_v49  ;;  %v640_v49 = vadd.f32 %v2501_v24, %v2511_v30  ;;  %v634_v24 = vadd.f32 %v2471_v12, %v2537_v47  ;;  %v625_v12 = vadd.f32 %v2415_v56, %v2570_v15  ;;  %v2685_v47 = vld [vmem:[%s3562_s4 + $0x20] sm:$0xff] }
 0x152   :  { %v619_v56 = vadd.f32 %v2379_v44, %v2578_v46  ;;  %v2712_v44 = vld [vmem:[%s3562_s4 + $0xe0] sm:$0xff] }
 0x153   :  { %1037 = vmatpush.msrb.mxu0 %v711_v43  ;;  %1873 = vmatpush.msra.mxu2 %v711_v43  ;;  %v2661_v43 = vld [vmem:[%s3562_s4 + $0x10] sm:$0xff]  ;;  %v726_v30 = vmax.f32 %v640_v49, 0.0  ;;  %v716_v15 = vmax.f32 %v625_v12, 0.0  ;;  %3627 = vst [vmem:[#allocation7_spill] sm:$0xff] %v2712_v44  ;;  %v2746_v49 = vld [vmem:[%s3562_s4 + $0x100] sm:$0xff] }
 0x154   :  { %v712_v27 = vmax.f32 %v619_v56, 0.0  ;;  %3629 = vst [vmem:[#allocation9_spill] sm:$0xff] %v2746_v49  ;;  %v2795_v56 = vld [vmem:[%s3562_s4 + $0x90] sm:$0xff] }
 0x155   :  { %1038 = vmatpush.msrb.mxu0 %v709_v37  ;;  %1874 = vmatpush.msra.mxu2 %v709_v37  ;;  %v722_v37 = vmax.f32 %v634_v24, 0.0  ;;  %v2760_v24 = vld [vmem:[%s3562_s4 + $0x110] sm:$0xff] }
 0x156   :  { %v2630_v42 = vpop.f32.mrf.mxu0  ;;  %3630 = vst [vmem:[#allocation10_spill] sm:$0xff] %v2760_v24 }
 0x157   :  { %1039 = vmatpush.msrb.mxu0 %v707_v31  ;;  %1875 = vmatpush.msra.mxu2 %v707_v31  ;;  %v2650_v34 = vpop.f32.mrf.mxu1  ;;  %v616_v31 = vadd.f32 %v2361_v38, %v2608_v8  ;;  %v613_v38 = vadd.f32 %v2343_v32, %v2612_v19  ;;  %v610_v8 = vadd.f32 %v2325_v26, %v2618_v29  ;;  %v2725_v32 = vld [vmem:[%s3562_s4 + $0x40] sm:$0xff]  ;;  %v2730_v19 = vld [vmem:[%s3562_s4 + $0xf0] sm:$0xff] }
 0x158   :  { %3628 = vst [vmem:[#allocation8_spill] sm:$0xff] %v2730_v19  ;;  %v2741_v29 = vld [vmem:[%s3562_s4 + $0x50] sm:$0xff] }
 0x159   :  { %1040 = vmatpush.msrb.mxu0 %v705_v25  ;;  %1876 = vmatpush.msra.mxu2 %v705_v25  ;;  %v710_v46 = vmax.f32 %v616_v31, 0.0  ;;  %v708_v2 = vmax.f32 %v613_v38, 0.0  ;;  %v706_v52 = vmax.f32 %v610_v8, 0.0  ;;  %v2814_v38 = vld [vmem:[%s3562_s4 + $0x150] sm:$0xff] }
 0x15a   :  { %1041 = vmatmul.f32.vlgmr.msrb.gmra.mxu0 %v2637_v3  ;;  %1074 = vmatmul.f32.vlgmr.msra.gmra.mxu2 %v2642_v10  ;;  %3634 = vst [vmem:[#allocation14_spill] sm:$0xff] %v2814_v38 }
 0x15b   :  { %1251 = vmatpush.msrb.mxu2 %v736_v59 }
 0x15d   :  { %1252 = vmatpush.msrb.mxu2 %v734_v16 }
 0x15e   :  { %v2654_v14 = vpop.f32.mrf.mxu0 }
 0x15f   :  { %1253 = vmatpush.msrb.mxu2 %v732_v23  ;;  %v2676_v5 = vpop.f32.mrf.mxu1 }
 0x161   :  { %1254 = vmatpush.msrb.mxu2 %v730_v53 }
 0x162   :  { %1044 = vmatmul.f32.gmra.mxu0 %v2661_v43  ;;  %1077 = vmatmul.f32.gmra.mxu2 %v2666_v28 }
 0x163   :  { %1255 = vmatpush.msrb.mxu2 %v728_v35  ;;  %v2755_v35 = vld [vmem:[%s3562_s4 + $0x60] sm:$0xff] }
 0x165   :  { %1256 = vmatpush.msrb.mxu2 %v726_v30 }
 0x166   :  { %v2678_v7 = vpop.f32.mrf.mxu0 }
 0x167   :  { %1257 = vmatpush.msrb.mxu2 %v724_v33  ;;  %v2702_v59 = vpop.f32.mrf.mxu1  ;;  %v2769_v33 = vld [vmem:[%s3562_s4 + $0x70] sm:$0xff] }
 0x169   :  { %1258 = vmatpush.msrb.mxu2 %v722_v37 }
 0x16a   :  { %1047 = vmatmul.f32.gmra.mxu0 %v2685_v47  ;;  %1080 = vmatmul.f32.gmra.mxu2 %v2690_v6 }
 0x16b   :  { %1259 = vmatpush.msrb.mxu2 %v720_v62  ;;  %v2783_v62 = vld [vmem:[%s3562_s4 + $0x80] sm:$0xff] }
 0x16d   :  { %1260 = vmatpush.msrb.mxu2 %v718_v54 }
 0x16e   :  { %v2700_v25 = vpop.f32.mrf.mxu0 }
 0x16f   :  { %1261 = vmatpush.msrb.mxu2 %v716_v15  ;;  %v2732_v23 = vpop.f32.mrf.mxu1  ;;  %v2800_v15 = vld [vmem:[%s3562_s4 + $0x140] sm:$0xff] }
 0x170   :  { %3633 = vst [vmem:[#allocation13_spill] sm:$0xff] %v2800_v15 }
 0x171   :  { %1262 = vmatpush.msrb.mxu2 %v714_v61 }
 0x172   :  { %1050 = vmatmul.f32.gmra.mxu0 %v2707_v50  ;;  %1083 = vmatmul.f32.gmra.mxu2 %v2712_v44 }
 0x173   :  { %1263 = vmatpush.msrb.mxu2 %v712_v27  ;;  %v2809_v27 = vld [vmem:[%s3562_s4 + $0xa0] sm:$0xff] }
 0x175   :  { %1264 = vmatpush.msrb.mxu2 %v710_v46 }
 0x176   :  { %v2720_v16 = vpop.f32.mrf.mxu0 }
 0x177   :  { %1265 = vmatpush.msrb.mxu2 %v708_v2  ;;  %v2750_v53 = vpop.f32.mrf.mxu1  ;;  %v2823_v2 = vld [vmem:[%s3562_s4 + $0x160] sm:$0xff] }
 0x178   :  { %3635 = vst [vmem:[#allocation15_spill] sm:$0xff] %v2823_v2 }
 0x179   :  { %1266 = vmatpush.msrb.mxu2 %v706_v52 }
 0x17a   :  { %1053 = vmatmul.f32.gmra.mxu0 %v2725_v32  ;;  %1086 = vmatmul.f32.gmra.mxu2 %v2730_v19 }
 0x17e   :  { %v2736_v26 = vpop.f32.mrf.mxu0 }
 0x17f   :  { %v2764_v30 = vpop.f32.mrf.mxu1 }
 0x182   :  { %1056 = vmatmul.f32.gmra.mxu0 %v2741_v29  ;;  %1089 = vmatmul.f32.gmra.mxu2 %v2746_v49 }
 0x186   :  { %v571_v45 = vpop.f32.mrf.mxu0 }
 0x187   :  { %v2778_v12 = vpop.f32.mrf.mxu1 }
 0x18a   :  { %1059 = vmatmul.f32.gmra.mxu0 %v2755_v35  ;;  %1092 = vmatmul.f32.gmra.mxu2 %v2760_v24 }
 0x18e   :  { %v574_v18 = vpop.f32.mrf.mxu0 }
 0x18f   :  { %v2802_v31 = vpop.f32.mrf.mxu1 }
 0x192   :  { %1062 = vmatmul.f32.gmra.mxu0 %v2769_v33  ;;  %1095 = vmatmul.f32.gmra.mxu2 %v2774_v1 }
 0x196   :  { %v577_v37 = vpop.f32.mrf.mxu0 }
 0x197   :  { %v2818_v46 = vpop.f32.mrf.mxu1  ;;  %v578_v44 = vadd.f32 %v577_v37, %v2522_v39 }
 0x19a   :  { %1065 = vmatmul.f32.gmra.mxu0 %v2783_v62  ;;  %1098 = vmatmul.f32.gmra.mxu2 %v2788_v48 }
 0x19e   :  { %v580_v54 = vpop.f32.mrf.mxu0 }
 0x19f   :  { %v2826_v52 = vpop.f32.mrf.mxu1  ;;  %v581_v19 = vadd.f32 %v580_v54, %v2497_v22  ;;  %v560_v54 = vadd.f32 %v2678_v7, %v2588_v13 }
 0x1a1   :  { %v761_v6 = vmax.f32 %v581_v19, 0.0 }
 0x1a2   :  { %1068 = vmatmul.f32.gmra.mxu0 %v2795_v56  ;;  %1101 = vmatmul.f32.gmra.mxu2 %v2800_v15 }
 0x1a6   :  { %v583_v61 = vpop.f32.mrf.mxu0 }
 0x1a7   :  { %v584_v24 = vadd.f32 %v583_v61, %v2492_v20  ;;  %v2840_v28 = vpop.f32.mrf.mxu1 }
 0x1aa   :  { %1071 = vmatmul.f32.gmra.mxu0 %v2809_v27  ;;  %1104 = vmatmul.f32.gmra.mxu2 %v2814_v38  ;;  %v2833_v38 = vld [vmem:[%s3562_s4 + $0x170] sm:$0xff] }
 0x1ae   :  { %v586_v8 = vpop.f32.mrf.mxu0 }
 0x1af   :  { %v587_v48 = vadd.f32 %v586_v8, %v2451_v4  ;;  %v763_v8 = vmax.f32 %v584_v24, 0.0  ;;  %v569_v24 = vadd.f32 %v2736_v26, %v2550_v57  ;;  %v2860_v26 = vpop.permute.xlu1 %218  ;;  %v699_v61 = vpop.f32.mrf.mxu1 }
 0x1b0   :  { %v551_v7 = vadd.f32 %v2614_v55, %v2860_v26 }
 0x1b2   :  { %1107 = vmatmul.f32.gmra.mxu2 %v2823_v2  ;;  %v765_v2 = vmax.f32 %v587_v48, 0.0  ;;  %v572_v48 = vadd.f32 %v571_v45, %v2528_v41  ;;  %v563_v45 = vadd.f32 %v2700_v25, %v2561_v0  ;;  %v557_v25 = vadd.f32 %v2654_v14, %v2592_v21  ;;  %v2876_v14 = vpop.permute.xlu0 %213 }
 0x1b4   :  { %v755_v37 = vmax.f32 %v572_v48, 0.0  ;;  %v745_v48 = vmax.f32 %v557_v25, 0.0  ;;  %v2900_v25 = vld [vmem:[%s3562_s4 + $0xb8] sm:$0xff] }
 0x1b5   :  { %3640 = vst [vmem:[#allocation20_spill] sm:$0xff] %v2900_v25 }
 0x1b6   :  { %v589_v15 = vpop.f32.mrf.mxu0 }
 0x1b7   :  { %v590_v1 = vadd.f32 %v589_v15, %v2465_v9  ;;  %v575_v15 = vadd.f32 %v574_v18, %v2526_v40  ;;  %v566_v18 = vadd.f32 %v2720_v16, %v2557_v63 }
 0x1b9   :  { %v767_v49 = vmax.f32 %v590_v1, 0.0  ;;  %v2845_v1 = vld [vmem:[%s3562_s4 + $0x180] sm:$0xff]  ;;  %v757_v19 = vmax.f32 %v575_v15, 0.0  ;;  %v751_v16 = vmax.f32 %v566_v18, 0.0  ;;  %v747_v15 = vmax.f32 %v560_v54, 0.0  ;;  %v702_v18 = vpop.f32.mrf.mxu1  ;;  %v2889_v54 = vld [vmem:[%s3562_s4 + $0x1b0] sm:$0xff] }
 0x1ba   :  { %1110 = vmatmul.f32.gmra.mxu2 %v2833_v38  ;;  %3636 = vst [vmem:[#allocation16_spill] sm:$0xff] %v2845_v1 }
 0x1bb   :  { %1138 = vmatpush.msrb.mxu1 %v767_v49  ;;  %1877 = vmatpush.msra.mxu3 %v767_v49  ;;  %v759_v49 = vmax.f32 %v578_v44, 0.0  ;;  %v753_v44 = vmax.f32 %v569_v24, 0.0  ;;  %v548_v24 = vadd.f32 %v2598_v36, %v2876_v14  ;;  %3639 = vst [vmem:[#allocation19_spill] sm:$0xff] %v2889_v54 }
 0x1bd   :  { %1139 = vmatpush.msrb.mxu1 %v765_v2  ;;  %1878 = vmatpush.msra.mxu3 %v765_v2  ;;  %v749_v2 = vmax.f32 %v563_v45, 0.0  ;;  %v739_v45 = vmax.f32 %v548_v24, 0.0  ;;  %v679_v24 = vadd.f32 %v2750_v53, %v2557_v63  ;;  %v2954_v63 = vld [vmem:[%s3562_s4 + $0xd8] sm:$0xff]  ;;  %v673_v53 = vadd.f32 %v2702_v59, %v2588_v13  ;;  %v2970_v13 = vld [vmem:[%s3562_s4 + $0x1e0] sm:$0xff] }
 0x1be   :  { %3644 = vst [vmem:[#allocation24_spill] sm:$0xff] %v2954_v63  ;;  %v664_v59 = vadd.f32 %v2622_v11, %v2860_v26 }
 0x1bf   :  { %1140 = vmatpush.msrb.mxu1 %v763_v8  ;;  %1879 = vmatpush.msra.mxu3 %v763_v8  ;;  %v554_v8 = vadd.f32 %v2630_v42, %v2596_v17  ;;  %3645 = vst [vmem:[#allocation25_spill] sm:$0xff] %v2970_v13 }
 0x1c0   :  { %v742_v26 = vmax.f32 %v664_v59, 0.0  ;;  %v3111_v59 = vld [vmem:[%s3562_s4 + $0xa8] sm:$0xff] }
 0x1c1   :  { %1141 = vmatpush.msrb.mxu1 %v761_v6  ;;  %1880 = vmatpush.msra.mxu3 %v761_v6  ;;  %v2858_v6 = vld [vmem:[%s3562_s4 + $0x190] sm:$0xff]  ;;  %v743_v42 = vmax.f32 %v554_v8, 0.0  ;;  %v691_v8 = vadd.f32 %v2818_v46, %v2522_v39  ;;  %v2926_v39 = vld [vmem:[%s3562_s4 + $0xc8] sm:$0xff]  ;;  %v685_v46 = vadd.f32 %v2778_v12, %v2528_v41  ;;  %v676_v12 = vadd.f32 %v2732_v23, %v2561_v0 }
 0x1c2   :  { %1113 = vmatmul.f32.gmra.mxu2 %v2845_v1  ;;  %3637 = vst [vmem:[#allocation17_spill] sm:$0xff] %v2858_v6  ;;  %v2942_v41 = vld [vmem:[%s3562_s4 + $0x1d0] sm:$0xff]  ;;  %v670_v0 = vadd.f32 %v2676_v5, %v2592_v21  ;;  %v2977_v21 = vld [vmem:[%s3562_s4 + $0x38] sm:$0xff] }
 0x1c3   :  { %1142 = vmatpush.msrb.mxu1 %v759_v49  ;;  %1881 = vmatpush.msra.mxu3 %v759_v49  ;;  %v2874_v49 = vld [vmem:[%s3562_s4 + $0x1a0] sm:$0xff]  ;;  %3642 = vst [vmem:[#allocation22_spill] sm:$0xff] %v2926_v39  ;;  %v750_v23 = vmax.f32 %v676_v12, 0.0  ;;  %v3073_v12 = vld [vmem:[%s3562_s4 + $0x88] sm:$0xff]  ;;  %v3690_v1 = vld [vmem:[#allocation9_spill] sm:$0xff] }
 0x1c4   :  { %3638 = vst [vmem:[#allocation18_spill] sm:$0xff] %v2874_v49 }
 0x1c5   :  { %1143 = vmatpush.msrb.mxu1 %v757_v19  ;;  %1882 = vmatpush.msra.mxu3 %v757_v19  ;;  %v2880_v19 = vpop.permute.xlu1 %208  ;;  %3643 = vst [vmem:[#allocation23_spill] sm:$0xff] %v2942_v41 }
 0x1c6   :  { %v545_v55 = vadd.f32 %v2581_v51, %v2880_v19  ;;  %v2894_v51 = vld [vmem:[%s3562_s4 + $0x8] sm:$0xff]  ;;  %v658_v11 = vadd.f32 %v2583_v60, %v2880_v19  ;;  %v3006_v60 = vld [vmem:[%s3562_s4 + $0xf8] sm:$0xff]  ;;  %3656 = vst [vmem:[#allocation36_spill] sm:$0xff] %v3073_v12 }
 0x1c7   :  { %1144 = vmatpush.msrb.mxu1 %v755_v37  ;;  %1883 = vmatpush.msra.mxu3 %v755_v37  ;;  %v741_v37 = vmax.f32 %v551_v7, 0.0  ;;  %3648 = vst [vmem:[#allocation28_spill] sm:$0xff] %v3006_v60 }
 0x1c8   :  { %v737_v36 = vmax.f32 %v545_v55, 0.0  ;;  %3662 = vst [vmem:[#allocation42_spill] sm:$0xff] %v3111_v59 }
 0x1c9   :  { %1145 = vmatpush.msrb.mxu1 %v753_v44  ;;  %1884 = vmatpush.msra.mxu3 %v753_v44  ;;  %v703_v44 = vadd.f32 %v702_v18, %v2465_v9  ;;  %v697_v9 = vadd.f32 %v2840_v28, %v2492_v20  ;;  %v2914_v20 = vld [vmem:[%s3562_s4 + $0x1c0] sm:$0xff]  ;;  %v688_v28 = vadd.f32 %v2802_v31, %v2526_v40 }
 0x1ca   :  { %1116 = vmatmul.f32.gmra.mxu2 %v2858_v6  ;;  %3641 = vst [vmem:[#allocation21_spill] sm:$0xff] %v2914_v20  ;;  %v682_v40 = vadd.f32 %v2764_v30, %v2550_v57  ;;  %v2949_v57 = vld [vmem:[%s3562_s4 + $0x28] sm:$0xff]  ;;  %v752_v30 = vmax.f32 %v679_v24, 0.0  ;;  %v3066_v24 = vpop.permute.xlu0 %937 }
 0x1cb   :  { %1146 = vmatpush.msrb.mxu1 %v751_v16  ;;  %1885 = vmatpush.msra.mxu3 %v751_v16  ;;  %v700_v16 = vadd.f32 %v699_v61, %v2451_v4  ;;  %v694_v4 = vadd.f32 %v2826_v52, %v2497_v22  ;;  %v2921_v22 = vld [vmem:[%s3562_s4 + $0x18] sm:$0xff]  ;;  %v760_v52 = vmax.f32 %v691_v8, 0.0  ;;  %v758_v31 = vmax.f32 %v688_v28, 0.0  ;;  %v3026_v8 = vpop.permute.xlu2 %942  ;;  %v3035_v28 = vld [vmem:[%s3562_s4 + $0x68] sm:$0xff] }
 0x1cc   :  { %v754_v55 = vmax.f32 %v682_v40, 0.0  ;;  %3651 = vst [vmem:[#allocation31_spill] sm:$0xff] %v3026_v8  ;;  %v3054_v40 = vld [vmem:[%s3562_s4 + $0x78] sm:$0xff] }
 0x1cd   :  { %1147 = vmatpush.msrb.mxu1 %v749_v2  ;;  %1886 = vmatpush.msra.mxu3 %v749_v2  ;;  %v768_v2 = vmax.f32 %v703_v44, 0.0  ;;  %v766_v61 = vmax.f32 %v700_v16, 0.0  ;;  %v762_v7 = vmax.f32 %v694_v4, 0.0  ;;  %v746_v44 = vmax.f32 %v670_v0, 0.0  ;;  %v3009_v19 = vpop.permute.xlu1 %1022  ;;  %v3018_v4 = vld [vmem:[%s3562_s4 + $0x58] sm:$0xff] }
 0x1ce   :  { %3649 = vst [vmem:[#allocation29_spill] sm:$0xff] %v3009_v19  ;;  %v3092_v0 = vld [vmem:[%s3562_s4 + $0x98] sm:$0xff] }
 0x1cf   :  { %1148 = vmatpush.msrb.mxu1 %v747_v15  ;;  %1887 = vmatpush.msra.mxu3 %v747_v15  ;;  %v764_v15 = vmax.f32 %v697_v9, 0.0  ;;  %v3001_v9 = vld [vmem:[%s3562_s4 + $0x48] sm:$0xff]  ;;  %3659 = vst [vmem:[#allocation39_spill] sm:$0xff] %v3092_v0 }
 0x1d1   :  { %1149 = vmatpush.msrb.mxu1 %v745_v48  ;;  %1888 = vmatpush.msra.mxu3 %v745_v48 }
 0x1d2   :  { %1119 = vmatmul.f32.gmra.mxu2 %v2874_v49 }
 0x1d3   :  { %1150 = vmatpush.msrb.mxu1 %v743_v42  ;;  %1889 = vmatpush.msra.mxu3 %v743_v42  ;;  %v756_v42 = vmax.f32 %v685_v46, 0.0 }
 0x1d5   :  { %1151 = vmatpush.msrb.mxu1 %v741_v37  ;;  %1890 = vmatpush.msra.mxu3 %v741_v37  ;;  %v667_v37 = vadd.f32 %v2650_v34, %v2596_v17  ;;  %v2982_v17 = vld [vmem:[%s3562_s4 + $0xe8] sm:$0xff]  ;;  %v661_v34 = vadd.f32 %v2602_v58, %v2876_v14  ;;  %v2996_v58 = vld [vmem:[%s3562_s4 + $0x1f0] sm:$0xff]  ;;  %v738_v14 = vmax.f32 %v658_v11, 0.0 }
 0x1d6   :  { %3646 = vst [vmem:[#allocation26_spill] sm:$0xff] %v2982_v17  ;;  %v3130_v11 = vld [vmem:[%s3562_s4 + $0x168] sm:$0xff] }
 0x1d7   :  { %1152 = vmatpush.msrb.mxu1 %v739_v45  ;;  %1891 = vmatpush.msra.mxu3 %v739_v45  ;;  %v748_v45 = vmax.f32 %v673_v53, 0.0  ;;  %v744_v5 = vmax.f32 %v667_v37, 0.0  ;;  %v740_v16 = vmax.f32 %v661_v34, 0.0  ;;  %3647 = vst [vmem:[#allocation27_spill] sm:$0xff] %v2996_v58 }
 0x1d8   :  { %3665 = vst [vmem:[#allocation45_spill] sm:$0xff] %v3130_v11 }
 0x1d9   :  { %1153 = vmatpush.msrb.mxu1 %v737_v36  ;;  %1892 = vmatpush.msra.mxu3 %v737_v36 }
 0x1da   :  { %1122 = vmatmul.f32.gmra.mxu2 %v2889_v54  ;;  %1154 = vmatmul.f32.vlgmr.msrb.gmra.mxu1 %v2894_v51 }
 0x1db   :  { %1187 = vmatmul.f32.vlgmr.msra.gmra.mxu3 %v2900_v25  ;;  %v3230_v25 = vld [vmem:[%s3562_s4 + $0x1d8] sm:$0xff] }
 0x1dc   :  { %1364 = vmatpush.msrb.mxu3 %v768_v2  ;;  %3682 = vst [vmem:[#allocation60_spill] sm:$0xff] %v3230_v25 }
 0x1dd   :  { %v2930_v48 = vpop.f32.mrf.mxu2 }
 0x1de   :  { %1365 = vmatpush.msrb.mxu3 %v766_v61  ;;  %v3023_v61 = vld [vmem:[%s3562_s4 + $0x108] sm:$0xff] }
 0x1df   :  { %3650 = vst [vmem:[#allocation30_spill] sm:$0xff] %v3023_v61 }
 0x1e0   :  { %1366 = vmatpush.msrb.mxu3 %v764_v15  ;;  %v3030_v15 = vpop.permute.xlu1 %927 }
 0x1e2   :  { %1367 = vmatpush.msrb.mxu3 %v762_v7  ;;  %1125 = vmatmul.f32.gmra.mxu2 %v2914_v20  ;;  %v3040_v7 = vld [vmem:[%s3562_s4 + $0x118] sm:$0xff] }
 0x1e3   :  { %1157 = vmatmul.f32.gmra.mxu1 %v2921_v22  ;;  %1190 = vmatmul.f32.gmra.mxu3 %v2926_v39  ;;  %3652 = vst [vmem:[#allocation32_spill] sm:$0xff] %v3040_v7 }
 0x1e4   :  { %1368 = vmatpush.msrb.mxu3 %v760_v52 }
 0x1e5   :  { %v2963_v18 = vpop.f32.mrf.mxu2 }
 0x1e6   :  { %1369 = vmatpush.msrb.mxu3 %v758_v31  ;;  %v3059_v31 = vld [vmem:[%s3562_s4 + $0x128] sm:$0xff] }
 0x1e7   :  { %3654 = vst [vmem:[#allocation34_spill] sm:$0xff] %v3059_v31 }
 0x1e8   :  { %1370 = vmatpush.msrb.mxu3 %v756_v42  ;;  %v3049_v52 = vpop.permute.xlu1 %1007 }
 0x1e9   :  { %3653 = vst [vmem:[#allocation33_spill] sm:$0xff] %v3049_v52 }
 0x1ea   :  { %1371 = vmatpush.msrb.mxu3 %v754_v55  ;;  %1128 = vmatmul.f32.gmra.mxu2 %v2942_v41  ;;  %v3078_v55 = vld [vmem:[%s3562_s4 + $0x138] sm:$0xff] }
 0x1eb   :  { %1160 = vmatmul.f32.gmra.mxu1 %v2949_v57  ;;  %1193 = vmatmul.f32.gmra.mxu3 %v2954_v63  ;;  %3657 = vst [vmem:[#allocation37_spill] sm:$0xff] %v3078_v55  ;;  %v3679_v41 = vld [vmem:[#allocation5_spill] sm:$0xff] }
 0x1ec   :  { %1372 = vmatpush.msrb.mxu3 %v752_v30  ;;  %v3087_v30 = vpop.permute.xlu0 %1017 }
 0x1ed   :  { %v2991_v36 = vpop.f32.mrf.mxu2  ;;  %3658 = vst [vmem:[#allocation38_spill] sm:$0xff] %v3087_v30 }
 0x1ee   :  { %1373 = vmatpush.msrb.mxu3 %v750_v23  ;;  %v3097_v23 = vld [vmem:[%s3562_s4 + $0x148] sm:$0xff] }
 0x1ef   :  { %3660 = vst [vmem:[#allocation40_spill] sm:$0xff] %v3097_v23 }
 0x1f0   :  { %1374 = vmatpush.msrb.mxu3 %v748_v45 }
 0x1f2   :  { %1375 = vmatpush.msrb.mxu3 %v746_v44  ;;  %1131 = vmatmul.f32.gmra.mxu2 %v2970_v13  ;;  %v3116_v44 = vld [vmem:[%s3562_s4 + $0x158] sm:$0xff] }
 0x1f3   :  { %1163 = vmatmul.f32.gmra.mxu1 %v2977_v21  ;;  %1196 = vmatmul.f32.gmra.mxu3 %v2982_v17  ;;  %3663 = vst [vmem:[#allocation43_spill] sm:$0xff] %v3116_v44 }
 0x1f4   :  { %1376 = vmatpush.msrb.mxu3 %v744_v5  ;;  %v3118_v34 = vpop.permute.xlu0 %922 }
 0x1f5   :  { %v3013_v2 = vpop.f32.mrf.mxu2 }
 0x1f6   :  { %1377 = vmatpush.msrb.mxu3 %v742_v26 }
 0x1f8   :  { %1378 = vmatpush.msrb.mxu3 %v740_v16 }
 0x1fa   :  { %1379 = vmatpush.msrb.mxu3 %v738_v14  ;;  %1134 = vmatmul.f32.gmra.mxu2 %v2996_v58  ;;  %v3200_v58 = vld [vmem:[%s3562_s4 + $0x1b8] sm:$0xff] }
 0x1fb   :  { %1166 = vmatmul.f32.gmra.mxu1 %v3001_v9  ;;  %1199 = vmatmul.f32.gmra.mxu3 %v3006_v60  ;;  %3676 = vst [vmem:[#allocation56_spill] sm:$0xff] %v3200_v58 }
 0x1fd   :  { %v3042_v46 = vpop.f32.mrf.mxu2 }
 0x202   :  { %1267 = vmatmul.f32.vlgmr.msrb.gmra.mxu2 %v2637_v3  ;;  %v3047_v3 = vpop.permute.xlu2 %932 }
 0x203   :  { %1169 = vmatmul.f32.gmra.mxu1 %v3018_v4  ;;  %1202 = vmatmul.f32.gmra.mxu3 %v3023_v61 }
 0x20a   :  { %1270 = vmatmul.f32.gmra.mxu2 %v2661_v43  ;;  %v3064_v43 = vpop.f32.mrf.mxu2  ;;  %v3068_v42 = vpop.permute.xlu2 %1012 }
 0x20b   :  { %1172 = vmatmul.f32.gmra.mxu1 %v3035_v28  ;;  %1205 = vmatmul.f32.gmra.mxu3 %v3040_v7  ;;  %3655 = vst [vmem:[#allocation35_spill] sm:$0xff] %v3068_v42 }
 0x212   :  { %1273 = vmatmul.f32.gmra.mxu2 %v2685_v47  ;;  %v3080_v47 = vpop.permute.xlu1 %912  ;;  %v3085_v53 = vpop.f32.mrf.mxu2 }
 0x213   :  { %1175 = vmatmul.f32.gmra.mxu1 %v3054_v40  ;;  %1208 = vmatmul.f32.gmra.mxu3 %v3059_v31  ;;  %v3099_v37 = vpop.permute.xlu2 %917  ;;  %v3158_v31 = vld [vmem:[%s3562_s4 + $0x188] sm:$0xff] }
 0x214   :  { %3669 = vst [vmem:[#allocation49_spill] sm:$0xff] %v3158_v31 }
 0x21a   :  { %1276 = vmatmul.f32.gmra.mxu2 %v2707_v50  ;;  %v3102_v50 = vpop.permute.xlu1 %992  ;;  %v3106_v45 = vpop.f32.mrf.mxu2 }
 0x21b   :  { %1178 = vmatmul.f32.gmra.mxu1 %v3073_v12  ;;  %1211 = vmatmul.f32.gmra.mxu3 %v3078_v55  ;;  %3661 = vst [vmem:[#allocation41_spill] sm:$0xff] %v3102_v50  ;;  %v1042_v55 = vpop.f32.mrf.mxu0  ;;  %v3171_v50 = vld [vmem:[%s3562_s4 + $0x198] sm:$0xff] }
 0x21c   :  { %3672 = vst [vmem:[#allocation52_spill] sm:$0xff] %v3171_v50 }
 0x222   :  { %1279 = vmatmul.f32.gmra.mxu2 %v2725_v32  ;;  %v3121_v32 = vpop.permute.xlu2 %997  ;;  %v3125_v5 = vpop.permute.xlu1 %897 }
 0x223   :  { %1181 = vmatmul.f32.gmra.mxu1 %v3092_v0  ;;  %1214 = vmatmul.f32.gmra.mxu3 %v3097_v23  ;;  %3664 = vst [vmem:[#allocation44_spill] sm:$0xff] %v3121_v32  ;;  %v3132_v26 = vpop.f32.mrf.mxu2  ;;  %v1045_v61 = vpop.f32.mrf.mxu0 }
 0x22a   :  { %1282 = vmatmul.f32.gmra.mxu2 %v2741_v29  ;;  %v3136_v29 = vpop.permute.xlu0 %1002  ;;  %v3138_v16 = vpop.permute.xlu2 %902 }
 0x22b   :  { %1184 = vmatmul.f32.gmra.mxu1 %v3111_v59  ;;  %1217 = vmatmul.f32.gmra.mxu3 %v3116_v44  ;;  %3666 = vst [vmem:[#allocation46_spill] sm:$0xff] %v3136_v29  ;;  %v3140_v14 = vpop.permute.xlu1 %977  ;;  %v3145_v44 = vld [vmem:[%s3562_s4 + $0x178] sm:$0xff]  ;;  %v3149_v23 = vpop.f32.mrf.mxu2 }
 0x22c   :  { %3667 = vst [vmem:[#allocation47_spill] sm:$0xff] %v3145_v44 }
 0x232   :  { %1285 = vmatmul.f32.gmra.mxu2 %v2755_v35  ;;  %v3151_v35 = vpop.permute.xlu0 %907 }
 0x233   :  { %1220 = vmatmul.f32.gmra.mxu3 %v3130_v11  ;;  %v3153_v11 = vpop.permute.xlu2 %982  ;;  %v3160_v7 = vpop.permute.xlu1 %882 }
 0x234   :  { %3668 = vst [vmem:[#allocation48_spill] sm:$0xff] %v3153_v11 }
 0x235   :  { %3670 = vst [vmem:[#allocation50_spill] sm:$0xff] %v3160_v7 }
 0x23a   :  { %1288 = vmatmul.f32.gmra.mxu2 %v2769_v33  ;;  %v3164_v33 = vpop.f32.mrf.mxu2 }
 0x23b   :  { %1223 = vmatmul.f32.gmra.mxu3 %v3145_v44  ;;  %v3166_v44 = vpop.permute.xlu0 %987  ;;  %v3173_v32 = vpop.permute.xlu2 %887 }
 0x23c   :  { %3671 = vst [vmem:[#allocation51_spill] sm:$0xff] %v3166_v44  ;;  %v3176_v29 = vpop.permute.xlu1 %962 }
 0x23d   :  { %3673 = vst [vmem:[#allocation53_spill] sm:$0xff] %v3176_v29 }
 0x242   :  { %1291 = vmatmul.f32.gmra.mxu2 %v2783_v62  ;;  %v3179_v62 = vpop.f32.mrf.mxu2 }
 0x243   :  { %1226 = vmatmul.f32.gmra.mxu3 %v3158_v31  ;;  %v3184_v31 = vld [vmem:[%s3562_s4 + $0x1a8] sm:$0xff]  ;;  %v3186_v52 = vpop.permute.xlu0 %892  ;;  %v3189_v42 = vpop.permute.xlu2 %967 }
 0x244   :  { %3674 = vst [vmem:[#allocation54_spill] sm:$0xff] %v3184_v31  ;;  %v3192_v19 = vpop.permute.xlu1 %867 }
 0x245   :  { %3675 = vst [vmem:[#allocation55_spill] sm:$0xff] %v3192_v19 }
 0x24a   :  { %1294 = vmatmul.f32.gmra.mxu2 %v2795_v56  ;;  %v1048_v56 = vpop.f32.mrf.mxu0  ;;  %v3202_v17 = vpop.f32.mrf.mxu2 }
 0x24b   :  { %1229 = vmatmul.f32.gmra.mxu3 %v3171_v50  ;;  %v1043_v50 = vadd.f32 %v1042_v55, %v3192_v19  ;;  %v3214_v19 = vld [vmem:[%s3562_s4 + $0x1c8] sm:$0xff] }
 0x24c   :  { %3678 = vst [vmem:[#allocation58_spill] sm:$0xff] %v3214_v19 }
 0x252   :  { %1297 = vmatmul.f32.gmra.mxu2 %v2809_v27  ;;  %v3206_v27 = vpop.permute.xlu0 %972  ;;  %v1051_v13 = vpop.f32.mrf.mxu0 }
 0x253   :  { %1232 = vmatmul.f32.gmra.mxu3 %v3184_v31  ;;  %v3208_v31 = vpop.permute.xlu2 %872  ;;  %v1052_v54 = vadd.f32 %v1051_v13, %v3160_v7  ;;  %v3257_v13 = vld [vmem:[%s3562_s4 + $0x1f8] sm:$0xff] }
 0x254   :  { %3677 = vst [vmem:[#allocation57_spill] sm:$0xff] %v3208_v31 }
 0x255   :  { %3688 = vst [vmem:[#allocation62_spill] sm:$0xff] %v3257_v13 }
 0x257   :  { %v1155_v30 = vpop.f32.mrf.mxu1 }
 0x258   :  { %v3195_v60 = vadd.f32 %v1155_v30, %v1043_v50  ;;  %v1046_v30 = vadd.f32 %v1045_v61, %v3208_v31 }
 0x25a   :  { %1300 = vmatmul.f32.gmra.mxu2 %v2642_v10  ;;  %v3220_v10 = vpop.f32.mrf.mxu2  ;;  %v3225_v61 = vpop.f32.mrf.mxu0 }
 0x25b   :  { %1235 = vmatmul.f32.gmra.mxu3 %v3200_v58  ;;  %3680 = vst [vmem:[#allocation5_spill] sm:$0xff] %v3220_v10  ;;  %v3222_v58 = vpop.permute.xlu0 %877 }
 0x25c   :  { %3681 = vst [vmem:[#allocation59_spill] sm:$0xff] %v3222_v58  ;;  %v1049_v20 = vadd.f32 %v1048_v56, %v3222_v58  ;;  %v3242_v58 = vld [vmem:[%s3562_s4 + $0x1e8] sm:$0xff] }
 0x25d   :  { %3685 = vst [vmem:[#allocation61_spill] sm:$0xff] %v3242_v58 }
 0x25e   :  { %v1188_v55 = vpop.f32.mrf.mxu3 }
 0x260   :  { %v1158_v50 = vpop.f32.mrf.mxu1 }
 0x261   :  { %v3216_v63 = vadd.f32 %v1158_v50, %v1046_v30 }
 0x262   :  { %1303 = vmatmul.f32.gmra.mxu2 %v3679_v41  ;;  %v3683_v41 = vld [vmem:[#allocation6_spill] sm:$0xff]  ;;  %v3236_v50 = vpop.f32.mrf.mxu2  ;;  %v3246_v49 = vpop.f32.mrf.mxu0 }
 0x263   :  { %1238 = vmatmul.f32.gmra.mxu3 %v3214_v19  ;;  %3684 = vst [vmem:[#allocation6_spill] sm:$0xff] %v3236_v50  ;;  %v3259_v7 = vpop.permute.xlu0 %957 }
 0x266   :  { %v1191_v39 = vpop.f32.mrf.mxu3 }
 0x268   :  { %v1161_v31 = vpop.f32.mrf.mxu1 }
 0x269   :  { %v3232_v30 = vadd.f32 %v1161_v31, %v1049_v20  ;;  %v3686_v20 = vld [vmem:[#allocation7_spill] sm:$0xff] }
 0x26a   :  { %1306 = vmatmul.f32.gmra.mxu2 %v3683_v41  ;;  %v3250_v41 = vpop.f32.mrf.mxu2 }
 0x26b   :  { %1241 = vmatmul.f32.gmra.mxu3 %v3230_v25  ;;  %3687 = vst [vmem:[#allocation7_spill] sm:$0xff] %v3250_v41  ;;  %v1082_v41 = vadd.f32 %v2991_v36, %v3047_v3  ;;  %v3281_v36 = vpop.permute.xlu0 %947 }
 0x26e   :  { %v1194_v19 = vpop.f32.mrf.mxu3 }
 0x270   :  { %v1164_v56 = vpop.f32.mrf.mxu1 }
 0x271   :  { %v3244_v59 = vadd.f32 %v1164_v56, %v1052_v54  ;;  %v3689_v54 = vld [vmem:[#allocation8_spill] sm:$0xff]  ;;  %v3263_v56 = vpop.f32.mrf.mxu0 }
 0x272   :  { %1309 = vmatmul.f32.gmra.mxu2 %v3686_v20  ;;  %v1085_v20 = vadd.f32 %v3013_v2, %v3066_v24  ;;  %v3275_v12 = vpop.f32.mrf.mxu2  ;;  %v1076_v2 = vadd.f32 %v2930_v48, %v3118_v34 }
 0x273   :  { %1244 = vmatmul.f32.gmra.mxu3 %v3242_v58  ;;  %v1088_v58 = vadd.f32 %v3042_v46, %v3026_v8 }
 0x276   :  { %v1197_v31 = vpop.f32.mrf.mxu3 }
 0x277   :  { %v1198_v0 = vadd.f32 %v1197_v31, %v1085_v20  ;;  %v3692_v20 = vld [vmem:[#allocation11_spill] sm:$0xff] }
 0x278   :  { %v3252_v25 = vpop.f32.mrf.mxu1 }
 0x279   :  { %v1505_v8 = vmax.f32 %v1198_v0, 0.0  ;;  %v3691_v0 = vld [vmem:[#allocation10_spill] sm:$0xff] }
 0x27a   :  { %1312 = vmatmul.f32.gmra.mxu2 %v3689_v54  ;;  %v1079_v54 = vadd.f32 %v2963_v18, %v3030_v15  ;;  %v1189_v18 = vadd.f32 %v1188_v55, %v1076_v2 }
 0x27b   :  { %1247 = vmatmul.f32.gmra.mxu3 %v3257_v13  ;;  %v1195_v13 = vadd.f32 %v1194_v19, %v1082_v41 }
 0x27c   :  { %v1192_v46 = vadd.f32 %v1191_v39, %v1079_v54  ;;  %v1499_v39 = vmax.f32 %v1189_v18, 0.0 }
 0x27d   :  { %v1503_v19 = vmax.f32 %v1195_v13, 0.0 }
 0x27e   :  { %v1200_v50 = vpop.f32.mrf.mxu3  ;;  %v1501_v31 = vmax.f32 %v1192_v46, 0.0 }
 0x27f   :  { %v1201_v6 = vadd.f32 %v1200_v50, %v1088_v58  ;;  %v1091_v58 = vadd.f32 %v3064_v43, %v3281_v36  ;;  %v3291_v43 = vpop.f32.mrf.mxu2 }
 0x280   :  { %v3271_v10 = vpop.f32.mrf.mxu1 }
 0x281   :  { %v1507_v44 = vmax.f32 %v1201_v6, 0.0  ;;  %v1063_v6 = vpop.f32.mrf.mxu0 }
 0x282   :  { %1315 = vmatmul.f32.gmra.mxu2 %v3690_v1 }
 0x283   :  { %1380 = vmatmul.f32.vlgmr.msrb.gmra.mxu3 %v2894_v51  ;;  %1549 = vmatpush.msra.mxu0 %v1507_v44  ;;  %v3289_v51 = vpop.permute.xlu2 %952 }
 0x285   :  { %1550 = vmatpush.msra.mxu0 %v1505_v8  ;;  %v1094_v8 = vadd.f32 %v3085_v53, %v3289_v51  ;;  %v3693_v53 = vld [vmem:[#allocation12_spill] sm:$0xff] }
 0x286   :  { %v1203_v50 = vpop.f32.mrf.mxu3 }
 0x287   :  { %v3285_v1 = vadd.f32 %v1203_v50, %v1091_v58  ;;  %1551 = vmatpush.msra.mxu0 %v1503_v19  ;;  %v3301_v54 = vpop.f32.mrf.mxu2  ;;  %v1100_v19 = vadd.f32 %v3132_v26, %v3176_v29 }
 0x288   :  { %v1173_v48 = vpop.f32.mrf.mxu1 }
 0x289   :  { %1552 = vmatpush.msra.mxu0 %v1501_v31  ;;  %v1066_v41 = vpop.f32.mrf.mxu0 }
 0x28a   :  { %1318 = vmatmul.f32.gmra.mxu2 %v3691_v0 }
 0x28b   :  { %1383 = vmatmul.f32.gmra.mxu3 %v2921_v22  ;;  %1553 = vmatpush.msra.mxu0 %v1499_v39  ;;  %v1097_v22 = vadd.f32 %v3106_v45, %v3259_v7  ;;  %v3694_v39 = vld [vmem:[#allocation13_spill] sm:$0xff] }
 0x28e   :  { %v1206_v44 = vpop.f32.mrf.mxu3 }
 0x28f   :  { %v3295_v55 = vadd.f32 %v1206_v44, %v1094_v8  ;;  %v1103_v8 = vadd.f32 %v3149_v23, %v3189_v42 }
 0x290   :  { %v1176_v13 = vpop.f32.mrf.mxu1 }
 0x291   :  { %v1069_v18 = vpop.f32.mrf.mxu0 }
 0x292   :  { %1321 = vmatmul.f32.gmra.mxu2 %v3692_v20 }
 0x293   :  { %1386 = vmatmul.f32.gmra.mxu3 %v2949_v57  ;;  %v3311_v57 = vpop.f32.mrf.mxu2 }
 0x296   :  { %v1209_v2 = vpop.f32.mrf.mxu3 }
 0x297   :  { %v3303_v46 = vadd.f32 %v1209_v2, %v1097_v22  ;;  %v1067_v2 = vadd.f32 %v1066_v41, %v3151_v35 }
 0x298   :  { %v1179_v58 = vpop.f32.mrf.mxu1 }
 0x299   :  { %v1072_v0 = vpop.f32.mrf.mxu0  ;;  %v1180_v29 = vadd.f32 %v1179_v58, %v1067_v2 }
 0x29a   :  { %1324 = vmatmul.f32.gmra.mxu2 %v3693_v53  ;;  %v1073_v20 = vadd.f32 %v1072_v0, %v3099_v37  ;;  %v1106_v0 = vadd.f32 %v3164_v33, %v3206_v27  ;;  %v3696_v33 = vld [vmem:[#allocation15_spill] sm:$0xff] }
 0x29b   :  { %1389 = vmatmul.f32.gmra.mxu3 %v2977_v21  ;;  %v1070_v21 = vadd.f32 %v1069_v18, %v3080_v47  ;;  %v1061_v18 = vadd.f32 %v3263_v56, %v3125_v5 }
 0x29e   :  { %v1212_v50 = vpop.f32.mrf.mxu3 }
 0x29f   :  { %v3309_v31 = vadd.f32 %v1212_v50, %v1100_v19  ;;  %v3322_v50 = vpop.f32.mrf.mxu2 }
 0x2a0   :  { %v1182_v45 = vpop.f32.mrf.mxu1 }
 0x2a1   :  { %v1183_v53 = vadd.f32 %v1182_v45, %v1070_v21  ;;  %v1174_v21 = vadd.f32 %v1173_v48, %v1061_v18 }
 0x2a2   :  { %1327 = vmatmul.f32.gmra.mxu2 %v3694_v39  ;;  %v3695_v39 = vld [vmem:[#allocation14_spill] sm:$0xff] }
 0x2a3   :  { %1392 = vmatmul.f32.gmra.mxu3 %v3001_v9  ;;  %v1064_v9 = vadd.f32 %v1063_v6, %v3138_v16  ;;  %v1495_v41 = vmax.f32 %v1183_v53, 0.0  ;;  %v1483_v53 = vmax.f32 %v3244_v59, 0.0 }
 0x2a6   :  { %v1215_v44 = vpop.f32.mrf.mxu3 }
 0x2a7   :  { %v3319_v26 = vadd.f32 %v1215_v44, %v1103_v8  ;;  %v1177_v8 = vadd.f32 %v1176_v13, %v1064_v9  ;;  %v1058_v44 = vadd.f32 %v3246_v49, %v3186_v52  ;;  %v3341_v49 = vpop.f32.mrf.mxu2  ;;  %v1477_v9 = vmax.f32 %v3195_v60, 0.0 }
 0x2a8   :  { %v1185_v22 = vpop.f32.mrf.mxu1 }
 0x2a9   :  { %v1186_v19 = vadd.f32 %v1185_v22, %v1073_v20  ;;  %v1493_v20 = vmax.f32 %v1180_v29, 0.0  ;;  %v1171_v56 = vadd.f32 %v3271_v10, %v1058_v44  ;;  %v1491_v58 = vmax.f32 %v1177_v8, 0.0  ;;  %v3701_v8 = vld [vmem:[#allocation17_spill] sm:$0xff] }
 0x2aa   :  { %1330 = vmatmul.f32.gmra.mxu2 %v3695_v39  ;;  %v1489_v22 = vmax.f32 %v1174_v21, 0.0  ;;  %v1109_v29 = vadd.f32 %v3179_v62, %v3140_v14  ;;  %v1479_v62 = vmax.f32 %v3216_v63, 0.0  ;;  %v3698_v63 = vld [vmem:[#allocation36_spill] sm:$0xff]  ;;  %v3703_v21 = vld [vmem:[#allocation18_spill] sm:$0xff] }
 0x2ab   :  { %v1497_v23 = vmax.f32 %v1186_v19, 0.0  ;;  %1395 = vmatmul.f32.gmra.mxu3 %v3018_v4  ;;  %v1055_v4 = vadd.f32 %v3225_v61, %v3173_v32  ;;  %v1487_v48 = vmax.f32 %v1171_v56, 0.0  ;;  %v3705_v56 = vld [vmem:[#allocation19_spill] sm:$0xff] }
 0x2ad   :  { %1554 = vmatpush.msra.mxu0 %v1497_v23  ;;  %v1168_v13 = vadd.f32 %v3252_v25, %v1055_v4  ;;  %v1481_v25 = vmax.f32 %v3232_v30, 0.0  ;;  %v3700_v30 = vld [vmem:[#allocation5_spill] sm:$0xff] }
 0x2ae   :  { %v1218_v45 = vpop.f32.mrf.mxu3 }
 0x2af   :  { %v3333_v6 = vadd.f32 %v1218_v45, %v1106_v0  ;;  %1555 = vmatpush.msra.mxu0 %v1495_v41  ;;  %v1485_v2 = vmax.f32 %v1168_v13, 0.0  ;;  %v3354_v19 = vpop.f32.mrf.mxu2  ;;  %v3702_v41 = vld [vmem:[#allocation39_spill] sm:$0xff] }
 0x2b1   :  { %1556 = vmatpush.msra.mxu0 %v1493_v20  ;;  %v3704_v20 = vld [vmem:[#allocation42_spill] sm:$0xff] }
 0x2b2   :  { %1333 = vmatmul.f32.gmra.mxu2 %v3696_v33 }
 0x2b3   :  { %1398 = vmatmul.f32.gmra.mxu3 %v3035_v28  ;;  %1557 = vmatpush.msra.mxu0 %v1491_v58  ;;  %v1112_v28 = vadd.f32 %v3202_v17, %v3153_v11  ;;  %v3697_v17 = vld [vmem:[#allocation16_spill] sm:$0xff]  ;;  %v3723_v11 = vld [vmem:[#allocation55_spill] sm:$0xff] }
 0x2b4   :  { %v3706_v58 = vld [vmem:[#allocation20_spill] sm:$0xff] }
 0x2b5   :  { %1558 = vmatpush.msra.mxu0 %v1489_v22  ;;  %v3707_v22 = vld [vmem:[#allocation21_spill] sm:$0xff] }
 0x2b6   :  { %v1221_v61 = vpop.f32.mrf.mxu3 }
 0x2b7   :  { %v3345_v10 = vadd.f32 %v1221_v61, %v1109_v29  ;;  %1559 = vmatpush.msra.mxu0 %v1487_v48  ;;  %v3371_v0 = vpop.f32.mrf.mxu2  ;;  %v3708_v29 = vld [vmem:[#allocation22_spill] sm:$0xff] }
 0x2b9   :  { %1560 = vmatpush.msra.mxu0 %v1485_v2  ;;  %v3709_v2 = vld [vmem:[#allocation23_spill] sm:$0xff] }
 0x2ba   :  { %1336 = vmatmul.f32.gmra.mxu2 %v2833_v38  ;;  %v3362_v38 = vld [vmem:[%s3564_s6] sm:$0xff] }
 0x2bb   :  { %1401 = vmatmul.f32.gmra.mxu3 %v3054_v40  ;;  %1561 = vmatpush.msra.mxu0 %v1483_v53  ;;  %v3699_v40 = vld [vmem:[#allocation51_spill] sm:$0xff]  ;;  %v3710_v53 = vld [vmem:[#allocation24_spill] sm:$0xff] }
 0x2bc   :  { %v1115_v23 = vadd.f32 %v3700_v30, %v3699_v40  ;;  %v3714_v30 = vld [vmem:[#allocation28_spill] sm:$0xff] }
 0x2bd   :  { %1562 = vmatpush.msra.mxu0 %v1481_v25 }
 0x2be   :  { %v1224_v39 = vpop.f32.mrf.mxu3 }
 0x2bf   :  { %v3357_v59 = vadd.f32 %v1224_v39, %v1112_v28  ;;  %1563 = vmatpush.msra.mxu0 %v1479_v62  ;;  %v3375_v44 = vpop.f32.mrf.mxu2  ;;  %v3711_v62 = vld [vmem:[#allocation25_spill] sm:$0xff]  ;;  %v3712_v39 = vld [vmem:[#allocation26_spill] sm:$0xff] }
 0x2c1   :  { %1564 = vmatpush.msra.mxu0 %v1477_v9 }
 0x2c2   :  { %1565 = vmatmul.f32.vlgmr.msra.gmra.mxu0 %v3362_v38  ;;  %1339 = vmatmul.f32.gmra.mxu2 %v3697_v17 }
 0x2c3   :  { %1404 = vmatmul.f32.gmra.mxu3 %v3698_v63  ;;  %v3713_v63 = vld [vmem:[#allocation27_spill] sm:$0xff] }
 0x2c6   :  { %v1227_v18 = vpop.f32.mrf.mxu3 }
 0x2c7   :  { %v3369_v60 = vadd.f32 %v1227_v18, %v1115_v23  ;;  %v3381_v33 = vpop.f32.mrf.mxu2  ;;  %v3715_v23 = vld [vmem:[#allocation38_spill] sm:$0xff] }
 0x2c8   :  { %v1133_v18 = vadd.f32 %v3311_v57, %v3715_v23  ;;  %v3720_v57 = vld [vmem:[#allocation30_spill] sm:$0xff] }
 0x2ca   :  { %1342 = vmatmul.f32.gmra.mxu2 %v3701_v8  ;;  %v3716_v8 = vld [vmem:[#allocation29_spill] sm:$0xff] }
 0x2cb   :  { %1407 = vmatmul.f32.gmra.mxu3 %v3702_v41  ;;  %v1136_v41 = vadd.f32 %v3322_v50, %v3716_v8  ;;  %v3721_v50 = vld [vmem:[#allocation44_spill] sm:$0xff]  ;;  %v3722_v8 = vld [vmem:[#allocation7_spill] sm:$0xff] }
 0x2cc   :  { %v1121_v23 = vadd.f32 %v3722_v8, %v3721_v50  ;;  %v3726_v8 = vld [vmem:[#allocation32_spill] sm:$0xff] }
 0x2ce   :  { %v1230_v45 = vpop.f32.mrf.mxu3 }
 0x2cf   :  { %v3385_v48 = vpop.f32.mrf.mxu2 }
 0x2d2   :  { %1345 = vmatmul.f32.gmra.mxu2 %v3703_v21 }
 0x2d3   :  { %1410 = vmatmul.f32.gmra.mxu3 %v3704_v20  ;;  %v3717_v20 = vld [vmem:[#allocation35_spill] sm:$0xff] }
 0x2d6   :  { %v1233_v4 = vpop.f32.mrf.mxu3 }
 0x2d7   :  { %v3389_v28 = vpop.f32.mrf.mxu2 }
 0x2da   :  { %1348 = vmatmul.f32.gmra.mxu2 %v3705_v56  ;;  %v1130_v56 = vadd.f32 %v3301_v54, %v3717_v20  ;;  %v1269_v54 = vadd.f32 %v3341_v49, %v3723_v11  ;;  %v3727_v11 = vld [vmem:[#allocation57_spill] sm:$0xff] }
 0x2db   :  { %1413 = vmatmul.f32.gmra.mxu3 %v3706_v58  ;;  %v1272_v49 = vadd.f32 %v3354_v19, %v3727_v11 }
 0x2de   :  { %v1236_v13 = vpop.f32.mrf.mxu3 }
 0x2df   :  { %v3393_v17 = vpop.f32.mrf.mxu2 }
 0x2e2   :  { %1351 = vmatmul.f32.gmra.mxu2 %v3707_v22 }
 0x2e3   :  { %1416 = vmatmul.f32.gmra.mxu3 %v3708_v29  ;;  %v3718_v29 = vld [vmem:[#allocation33_spill] sm:$0xff] }
 0x2e6   :  { %v1239_v61 = vpop.f32.mrf.mxu3 }
 0x2ea   :  { %1354 = vmatmul.f32.gmra.mxu2 %v3709_v2  ;;  %v1127_v2 = vadd.f32 %v3291_v43, %v3718_v29 }
 0x2eb   :  { %1419 = vmatmul.f32.gmra.mxu3 %v3710_v53 }
 0x2ee   :  { %v1242_v25 = vpop.f32.mrf.mxu3 }
 0x2ef   :  { %v1243_v53 = vadd.f32 %v1242_v25, %v1130_v56  ;;  %v3724_v25 = vld [vmem:[#allocation41_spill] sm:$0xff]  ;;  %v1234_v56 = vadd.f32 %v1233_v4, %v1121_v23  ;;  %v1523_v23 = vmax.f32 %v3357_v59, 0.0  ;;  %v1515_v59 = vmax.f32 %v3309_v31, 0.0 }
 0x2f0   :  { %v1281_v31 = vadd.f32 %v3381_v33, %v3173_v32  ;;  %v3735_v33 = vld [vmem:[#allocation47_spill] sm:$0xff] }
 0x2f2   :  { %1357 = vmatmul.f32.gmra.mxu2 %v3711_v62 }
 0x2f3   :  { %1422 = vmatmul.f32.gmra.mxu3 %v3712_v39  ;;  %v3719_v39 = vld [vmem:[#allocation46_spill] sm:$0xff] }
 0x2f6   :  { %v1245_v9 = vpop.f32.mrf.mxu3 }
 0x2f7   :  { %v1246_v58 = vadd.f32 %v1245_v9, %v1133_v18  ;;  %v1535_v18 = vmax.f32 %v1243_v53, 0.0  ;;  %v1525_v53 = vmax.f32 %v3369_v60, 0.0  ;;  %v1517_v60 = vmax.f32 %v3319_v26, 0.0 }
 0x2f9   :  { %v1537_v40 = vmax.f32 %v1246_v58, 0.0 }
 0x2fa   :  { %1360 = vmatmul.f32.gmra.mxu2 %v3713_v63  ;;  %v1124_v63 = vadd.f32 %v3275_v12, %v3719_v39 }
 0x2fb   :  { %1425 = vmatmul.f32.gmra.mxu3 %v3714_v30  ;;  %v1240_v30 = vadd.f32 %v1239_v61, %v1127_v2  ;;  %v1529_v2 = vmax.f32 %v1234_v56, 0.0 }
 0x2fc   :  { %v1237_v9 = vadd.f32 %v1236_v13, %v1124_v63  ;;  %v1292_v63 = vpop.f32.mrf.mxu2 }
 0x2fd   :  { %v1533_v12 = vmax.f32 %v1240_v30, 0.0  ;;  %v3729_v30 = vld [vmem:[#allocation59_spill] sm:$0xff] }
 0x2fe   :  { %v1248_v21 = vpop.f32.mrf.mxu3  ;;  %v1275_v19 = vadd.f32 %v3371_v0, %v3729_v30  ;;  %v3731_v0 = vld [vmem:[#allocation50_spill] sm:$0xff] }
 0x2ff   :  { %v1249_v22 = vadd.f32 %v1248_v21, %v1136_v41  ;;  %v3725_v41 = vld [vmem:[#allocation6_spill] sm:$0xff] }
 0x300   :  { %v1118_v21 = vadd.f32 %v3725_v41, %v3724_v25 }
 0x301   :  { %v1539_v62 = vmax.f32 %v1249_v22, 0.0  ;;  %v1531_v22 = vmax.f32 %v1237_v9, 0.0 }
 0x302   :  { %v1231_v58 = vadd.f32 %v1230_v45, %v1118_v21  ;;  %v1521_v45 = vmax.f32 %v3345_v10, 0.0  ;;  %v1513_v10 = vmax.f32 %v3303_v46, 0.0  ;;  %v1509_v21 = vmax.f32 %v3285_v1, 0.0  ;;  %v3445_v46 = vld [vmem:[%s3564_s6 + $0x8] sm:$0xff] }
 0x303   :  { %1428 = vmatmul.f32.gmra.mxu3 %v3720_v57  ;;  %1569 = vmatpush.msra.mxu1 %v1539_v62  ;;  %v3728_v62 = vld [vmem:[#allocation34_spill] sm:$0xff]  ;;  %v1519_v57 = vmax.f32 %v3333_v6, 0.0  ;;  %v1278_v6 = vadd.f32 %v3375_v44, %v3731_v0 }
 0x304   :  { %v3437_v41 = vpop.f32.mrf.mxu2 }
 0x305   :  { %1570 = vmatpush.msra.mxu1 %v1537_v40  ;;  %v1527_v40 = vmax.f32 %v1231_v58, 0.0  ;;  %v3733_v58 = vld [vmem:[#allocation43_spill] sm:$0xff] }
 0x306   :  { %v1381_v43 = vpop.f32.mrf.mxu3 }
 0x307   :  { %v3414_v61 = vadd.f32 %v1381_v43, %v1269_v54  ;;  %1571 = vmatpush.msra.mxu1 %v1535_v18  ;;  %v3730_v18 = vld [vmem:[#allocation37_spill] sm:$0xff]  ;;  %v1511_v43 = vmax.f32 %v3295_v55, 0.0  ;;  %v3732_v55 = vld [vmem:[#allocation40_spill] sm:$0xff] }
 0x309   :  { %1572 = vmatpush.msra.mxu1 %v1533_v12 }
 0x30b   :  { %1431 = vmatmul.f32.gmra.mxu3 %v3726_v8  ;;  %1573 = vmatpush.msra.mxu1 %v1531_v22  ;;  %v1284_v22 = vadd.f32 %v3385_v48, %v3186_v52  ;;  %v3736_v48 = vld [vmem:[#allocation49_spill] sm:$0xff] }
 0x30c   :  { %v1298_v1 = vpop.f32.mrf.mxu2 }
 0x30d   :  { %1574 = vmatpush.msra.mxu1 %v1529_v2 }
 0x30e   :  { %v1384_v13 = vpop.f32.mrf.mxu3 }
 0x30f   :  { %v3420_v4 = vadd.f32 %v1384_v13, %v1272_v49  ;;  %1575 = vmatpush.msra.mxu1 %v1527_v40  ;;  %v3734_v49 = vld [vmem:[#allocation45_spill] sm:$0xff]  ;;  %v1287_v40 = vadd.f32 %v3389_v28, %v3125_v5  ;;  %v3737_v5 = vld [vmem:[#allocation52_spill] sm:$0xff] }
 0x311   :  { %1576 = vmatpush.msra.mxu1 %v1525_v53 }
 0x313   :  { %1434 = vmatmul.f32.gmra.mxu3 %v3728_v62  ;;  %1577 = vmatpush.msra.mxu1 %v1523_v23  ;;  %v1290_v23 = vadd.f32 %v3393_v17, %v3138_v16  ;;  %v1293_v62 = vadd.f32 %v1292_v63, %v3151_v35  ;;  %v3740_v17 = vld [vmem:[#allocation58_spill] sm:$0xff] }
 0x314   :  { %v1301_v11 = vpop.f32.mrf.mxu2 }
 0x315   :  { %1578 = vmatpush.msra.mxu1 %v1521_v45 }
 0x316   :  { %v1387_v54 = vpop.f32.mrf.mxu3 }
 0x317   :  { %v3429_v9 = vadd.f32 %v1387_v54, %v1275_v19  ;;  %1579 = vmatpush.msra.mxu1 %v1519_v57 }
 0x319   :  { %1580 = vmatpush.msra.mxu1 %v1517_v60  ;;  %v3738_v60 = vld [vmem:[#allocation54_spill] sm:$0xff] }
 0x31b   :  { %1437 = vmatmul.f32.gmra.mxu3 %v3730_v18  ;;  %1581 = vmatpush.msra.mxu1 %v1515_v59  ;;  %v3739_v18 = vld [vmem:[#allocation56_spill] sm:$0xff] }
 0x31c   :  { %v1304_v53 = vpop.f32.mrf.mxu2 }
 0x31d   :  { %1582 = vmatpush.msra.mxu1 %v1513_v10 }
 0x31e   :  { %v1390_v26 = vpop.f32.mrf.mxu3 }
 0x31f   :  { %v3440_v56 = vadd.f32 %v1390_v26, %v1278_v6  ;;  %1583 = vmatpush.msra.mxu1 %v1511_v43  ;;  %v3741_v6 = vld [vmem:[#allocation60_spill] sm:$0xff]  ;;  %v3742_v26 = vld [vmem:[#allocation61_spill] sm:$0xff] }
 0x321   :  { %1584 = vmatpush.msra.mxu1 %v1509_v21 }
 0x322   :  { %1585 = vmatmul.f32.vlgmr.msra.gmra.mxu1 %v3445_v46 }
 0x323   :  { %1440 = vmatmul.f32.gmra.mxu3 %v3732_v55 }
 0x324   :  { %v1307_v30 = vpop.f32.mrf.mxu2 }
 0x326   :  { %v1393_v44 = vpop.f32.mrf.mxu3 }
 0x327   :  { %v3451_v12 = vadd.f32 %v1393_v44, %v1281_v31  ;;  %v3743_v31 = vld [vmem:[#allocation62_spill] sm:$0xff] }
 0x32b   :  { %1443 = vmatmul.f32.gmra.mxu3 %v3733_v58  ;;  %v3744_v58 = vld [vmem:[#allocation31_spill] sm:$0xff] }
 0x32c   :  { %v1310_v54 = vpop.f32.mrf.mxu2 }
 0x32d   :  { %v1311_v44 = vadd.f32 %v1310_v54, %v3066_v24 }
 0x32e   :  { %v1396_v2 = vpop.f32.mrf.mxu3 }
 0x32f   :  { %v3456_v8 = vadd.f32 %v1396_v2, %v1284_v22 }
 0x333   :  { %1446 = vmatmul.f32.gmra.mxu3 %v3734_v49  ;;  %v1308_v49 = vadd.f32 %v1307_v30, %v3047_v3  ;;  %v1296_v30 = vadd.f32 %v3437_v41, %v3080_v47  ;;  %v1657_v41 = vld [vmem:[%s3559_s1] sm:$0xff]  ;;  %s1949_s1 = smov [#allocation2]  }
 0x334   :  { %v1313_v10 = vpop.f32.mrf.mxu2  ;;  %1660 = vst [vmem:[#allocation1 + $0x1] ss:$2 sm:$0xff] %v1657_v41  ;;  %s1750_s28 = sshll.u32 %s1949_s1, 4  ;;  %s1751_s28 = int_to_ptr.vmem [resolvable:$true] %s1750_s28 }
 0x335   :  { %v1314_v22 = vadd.f32 %v1313_v10, %v3744_v58 }
 0x336   :  { %v1399_v13 = vpop.f32.mrf.mxu3 }
 0x337   :  { %v3461_v32 = vadd.f32 %v1399_v13, %v1287_v40 }
 0x33b   :  { %1449 = vmatmul.f32.gmra.mxu3 %v3735_v33  ;;  %v1305_v33 = vadd.f32 %v1304_v53, %v3030_v15 }
 0x33c   :  { %v1316_v43 = vpop.f32.mrf.mxu2 }
 0x33d   :  { %v1317_v24 = vadd.f32 %v1316_v43, %v3281_v36 }
 0x33e   :  { %v1402_v45 = vpop.f32.mrf.mxu3 }
 0x33f   :  { %v3466_v52 = vadd.f32 %v1402_v45, %v1290_v23 }
 0x341   :  { %v1492_v47 = vmax.f32 %v3466_v52, 0.0  ;;  %v1484_v52 = vmax.f32 %v3440_v56, 0.0 }
 0x343   :  { %1452 = vmatmul.f32.gmra.mxu3 %v3736_v48 }
 0x344   :  { %v1319_v35 = vpop.f32.mrf.mxu2 }
 0x345   :  { %v1320_v36 = vadd.f32 %v1319_v35, %v3289_v51  ;;  %v1486_v35 = vmax.f32 %v3451_v12, 0.0  ;;  %v1478_v12 = vmax.f32 %v3414_v61, 0.0 }
 0x346   :  { %v1405_v19 = vpop.f32.mrf.mxu3 }
 0x347   :  { %v1406_v57 = vadd.f32 %v1405_v19, %v1293_v62  ;;  %v1302_v62 = vadd.f32 %v1301_v11, %v3118_v34 }
 0x349   :  { %v1494_v43 = vmax.f32 %v1406_v57, 0.0 }
 0x34b   :  { %1455 = vmatmul.f32.gmra.mxu3 %v3737_v5 }
 0x34c   :  { %v1322_v55 = vpop.f32.mrf.mxu2 }
 0x34d   :  { %v1323_v51 = vadd.f32 %v1322_v55, %v3259_v7  ;;  %v1480_v7 = vmax.f32 %v3420_v4, 0.0 }
 0x34e   :  { %v1408_v28 = vpop.f32.mrf.mxu3 }
 0x34f   :  { %v1409_v34 = vadd.f32 %v1408_v28, %v1296_v30  ;;  %v1490_v28 = vmax.f32 %v3461_v32, 0.0  ;;  %v1566_v32 = vpop.f32.mrf.mxu0 }
 0x353   :  { %1458 = vmatmul.f32.gmra.mxu3 %v3738_v60  ;;  %v1299_v60 = vadd.f32 %v1298_v1, %v3099_v37  ;;  %v1496_v1 = vmax.f32 %v1409_v34, 0.0 }
 0x354   :  { %v1325_v48 = vpop.f32.mrf.mxu2 }
 0x356   :  { %v1411_v59 = vpop.f32.mrf.mxu3 }
 0x357   :  { %v1412_v15 = vadd.f32 %v1411_v59, %v1299_v60  ;;  %v1488_v59 = vmax.f32 %v3456_v8, 0.0  ;;  %v3745_v8 = vld [vmem:[#allocation53_spill] sm:$0xff] }
 0x358   :  { %v1326_v55 = vadd.f32 %v1325_v48, %v3745_v8 }
 0x35b   :  { %1461 = vmatmul.f32.gmra.mxu3 %v3739_v18 }
 0x35c   :  { %v1328_v37 = vpop.f32.mrf.mxu2 }
 0x35d   :  { %v1329_v61 = vadd.f32 %v1328_v37, %v3189_v42 }
 0x35e   :  { %v1414_v16 = vpop.f32.mrf.mxu3 }
 0x35f   :  { %v1415_v54 = vadd.f32 %v1414_v16, %v1302_v62 }
 0x361   :  { %v1500_v11 = vmax.f32 %v1415_v54, 0.0 }
 0x363   :  { %1464 = vmatmul.f32.gmra.mxu3 %v3740_v17  ;;  %v1498_v17 = vmax.f32 %v1412_v15, 0.0 }
 0x364   :  { %v1331_v57 = vpop.f32.mrf.mxu2 }
 0x366   :  { %v1417_v0 = vpop.f32.mrf.mxu3 }
 0x367   :  { %v1418_v19 = vadd.f32 %v1417_v0, %v1305_v33 }
 0x369   :  { %v1502_v53 = vmax.f32 %v1418_v19, 0.0  ;;  %v1332_v19 = vadd.f32 %v1331_v57, %v3206_v27 }
 0x36b   :  { %1467 = vmatmul.f32.gmra.mxu3 %v3741_v6 }
 0x36e   :  { %v1420_v63 = vpop.f32.mrf.mxu3 }
 0x36f   :  { %v1421_v23 = vadd.f32 %v1420_v63, %v1308_v49  ;;  %v3511_v49 = vld.sshfl [vmem:[#allocation1 + $0x8] sm:$0xff pattern:$0x75316420] }
 0x371   :  { %v1504_v10 = vmax.f32 %v1421_v23, 0.0 }
 0x373   :  { %1470 = vmatmul.f32.gmra.mxu3 %v3742_v26  ;;  %v1482_v26 = vmax.f32 %v3429_v9, 0.0  ;;  %v1661_v9 = vld.sshfl [vmem:[#allocation1] sm:$0xff pattern:$0x75316420] }
 0x376   :  { %v1423_v21 = vpop.f32.mrf.mxu3 }
 0x377   :  { %v1424_v40 = vadd.f32 %v1423_v21, %v1311_v44  ;;  %v1683_v21 = vmul.f32 0.5, %v1657_v41 }
 0x379   :  { %v1506_v5 = vmax.f32 %v1424_v40, 0.0  ;;  %v1334_v40 = vpop.f32.mrf.mxu2 }
 0x37a   :  { %v1335_v42 = vadd.f32 %v1334_v40, %v3140_v14  ;;  %v3747_v14 = vld [vmem:[#allocation51_spill] sm:$0xff] }
 0x37b   :  { %1473 = vmatmul.f32.gmra.mxu3 %v3743_v31  ;;  %v3503_v31 = vpop.permute.xlu1 %1546 }
 0x37c   :  { %v1567_v44 = vadd.f32 %v1566_v32, %v3503_v31 }
 0x37e   :  { %v1426_v2 = vpop.f32.mrf.mxu3 }
 0x37f   :  { %v1427_v13 = vadd.f32 %v1426_v2, %v1314_v22  ;;  %v1684_v22 = vmul.f32 %v1683_v21, %v1657_v41 }
 0x381   :  { %v1508_v45 = vmax.f32 %v1427_v13, 0.0  ;;  %1687 = vst [vmem:[#allocation1 + $0x1] ss:$2 sm:$0xff] %v1684_v22  ;;  %v1337_v48 = vpop.f32.mrf.mxu2 }
 0x383   :  { %1589 = vmatpush.msrb.mxu0 %v1508_v45 }
 0x385   :  { %1590 = vmatpush.msrb.mxu0 %v1506_v5 }
 0x386   :  { %v1429_v3 = vpop.f32.mrf.mxu3 }
 0x387   :  { %v3486_v18 = vadd.f32 %v1429_v3, %v1317_v24  ;;  %1591 = vmatpush.msrb.mxu0 %v1504_v10 }
 0x389   :  { %1592 = vmatpush.msrb.mxu0 %v1502_v53 }
 0x38b   :  { %1593 = vmatpush.msrb.mxu0 %v1500_v11 }
 0x38d   :  { %1594 = vmatpush.msrb.mxu0 %v1498_v17 }
 0x38e   :  { %v1432_v16 = vpop.f32.mrf.mxu3 }
 0x38f   :  { %v3489_v0 = vadd.f32 %v1432_v16, %v1320_v36  ;;  %1595 = vmatpush.msrb.mxu0 %v1496_v1  ;;  %v3746_v1 = vld [vmem:[#allocation48_spill] sm:$0xff] }
 0x390   :  { %v1338_v16 = vadd.f32 %v1337_v48, %v3746_v1  ;;  %v3749_v1 = vld [vmem:[#allocation29_spill] sm:$0xff] }
 0x391   :  { %1596 = vmatpush.msrb.mxu0 %v1494_v43 }
 0x393   :  { %1597 = vmatpush.msrb.mxu0 %v1492_v47 }
 0x395   :  { %1598 = vmatpush.msrb.mxu0 %v1490_v28 }
 0x396   :  { %v1435_v6 = vpop.f32.mrf.mxu3 }
 0x397   :  { %v3499_v63 = vadd.f32 %v1435_v6, %v1323_v51  ;;  %1599 = vmatpush.msrb.mxu0 %v1488_v59 }
 0x399   :  { %1600 = vmatpush.msrb.mxu0 %v1486_v35 }
 0x39b   :  { %1601 = vmatpush.msrb.mxu0 %v1484_v52 }
 0x39d   :  { %1602 = vmatpush.msrb.mxu0 %v1482_v26 }
 0x39e   :  { %v1438_v58 = vpop.f32.mrf.mxu3 }
 0x39f   :  { %v3509_v56 = vadd.f32 %v1438_v58, %v1326_v55  ;;  %v1586_v2 = vpop.f32.mrf.mxu1  ;;  %1603 = vmatpush.msrb.mxu0 %v1480_v7 }
 0x3a0   :  { %v1587_v13 = vadd.f32 %v1586_v2, %v1567_v44 }
 0x3a1   :  { %1604 = vmatpush.msrb.mxu0 %v1478_v12 }
 0x3a2   :  { %v1631_v4 = vmin.f32 %v1587_v13, 20.0  ;;  %1605 = vmatmul.f32.vlgmr.msrb.gmra.mxu0 %v3362_v38  ;;  %v1340_v38 = vpop.f32.mrf.mxu2  ;;  %vm1629_vm2 = vcmp.gt.f32.partialorder %v1587_v13, 20.0 }
 0x3a3   :  { %v1341_v51 = vadd.f32 %v1340_v38, %v3747_v14 }
 0x3a4   :  { %v1633_v33 = vmul.f32 1.442695, %v1631_v4 }
 0x3a6   :  { %1898 = vpow2.f32 %v1633_v33  ;;  %v1441_v23 = vpop.f32.mrf.mxu3 }
 0x3a7   :  { %v3515_v45 = vadd.f32 %v1441_v23, %v1329_v61 }
 0x3aa   :  { %v3524_v43 = vpop.f32.mrf.mxu2 }
 0x3ac   :  { %v1899_v62 = vpop.eup %1898 }
 0x3ad   :  { %v1637_v5 = vadd.f32 1.0, %v1899_v62  ;;  %v1640_v60 = vmul.f32 -0.5, %v1899_v62  ;;  %v1643_v3 = vand.u32 2147483647, %v1899_v62 }
 0x3ae   :  { %v1444_v24 = vpop.f32.mrf.mxu3 }
 0x3af   :  { %1900 = vlog2.f32 %v1637_v5  ;;  %v3518_v54 = vadd.f32 %v1444_v24, %v1332_v19  ;;  %v1641_v10 = vadd.f32 1.0, %v1640_v60  ;;  %vm1644_vm1 = vcmp.lt.f32.partialorder %v1643_v3, 0.0004427343 }
 0x3b1   :  { %v1642_v53 = vmul.f32 %v1899_v62, %v1641_v10 }
 0x3b2   :  { %v1346_v35 = vpop.f32.mrf.mxu2 }
 0x3b5   :  { %v1901_v30 = vpop.eup %1900 }
 0x3b6   :  { %v1639_v15 = vmul.f32 0.6931472, %v1901_v30  ;;  %v1447_v34 = vpop.f32.mrf.mxu3 }
 0x3b7   :  { %v3521_v11 = vadd.f32 %v1447_v34, %v1335_v42 }
 0x3b8   :  { %v1645_v27 = vsel %vm1644_vm1, %v1642_v53, %v1639_v15 }
 0x3b9   :  { %v1655_v17 = vsel %vm1629_vm2, %v1587_v13, %v1645_v27 }
 0x3ba   :  { %v1665_v37 = vmul.f32 %v1661_v9, %v1655_v17  ;;  %v1349_v55 = vpop.f32.mrf.mxu2  ;;  %v1688_v9 = vld.sshfl [vmem:[#allocation1] sm:$0xff pattern:$0x75316420] }
 0x3bc   :  { %v1669_v36 = vrot.slane %v1665_v37, 4  ;;  %v3748_v37 = vld [vmem:[#allocation38_spill] sm:$0xff] }
 0x3be   :  { %v1673_v47 = vadd.f32 %v1669_v36, %v1587_v13  ;;  %v1450_v41 = vpop.f32.mrf.mxu3 }
 0x3bf   :  { %v3526_v28 = vadd.f32 %v1450_v41, %v1338_v16 }
 0x3c0   :  { %1902 = vtanh.f32 %v1673_v47 }
 0x3c2   :  { %v1352_v13 = vpop.f32.mrf.mxu2 }
 0x3c6   :  { %v1903_v59 = vpop.eup %1902  ;;  %v1453_v57 = vpop.f32.mrf.mxu3 }
 0x3c7   :  { %1904 = vtanh.f32 %v1903_v59  ;;  %v3529_v6 = vadd.f32 %v1453_v57, %v1341_v51  ;;  %v1859_v15 = vclamps-f32 %v1903_v59, 1.0  ;;  %v1353_v57 = vadd.f32 %v1352_v13, %v3718_v29 }
 0x3c8   :  { %1906 = vlog2.f32 %v1655_v17  ;;  %v1350_v59 = vadd.f32 %v1349_v55, %v3719_v39 }
 0x3c9   :  { %v1526_v55 = vmax.f32 %v3529_v6, 0.0  ;;  %v1512_v6 = vmax.f32 %v3489_v0, 0.0 }
 0x3ca   :  { %v1355_v5 = vpop.f32.mrf.mxu2 }
 0x3cb   :  { %v1356_v41 = vadd.f32 %v1355_v5, %v3717_v20 }
 0x3cd   :  { %v1905_v52 = vpop.eup %1904 }
 0x3ce   :  { %v1907_v26 = vpop.eup %1906  ;;  %v1698_v32 = vmul.f32 %v1905_v52, %v1905_v52  ;;  %v1456_v21 = vpop.f32.mrf.mxu3 }
 0x3cf   :  { %v1676_v8 = vmul.f32 0.6931472, %v1907_v26 }
 0x3d0   :  { %v1700_v7 = vsub.f32 1.0, %v1698_v32 }
 0x3d1   :  { %v1679_v44 = vsub.f32 0.0, %v1676_v8  ;;  %v1347_v8 = vadd.f32 %v1346_v35, %v3721_v50  ;;  %v1524_v50 = vmax.f32 %v3526_v28, 0.0  ;;  %v1522_v35 = vmax.f32 %v3521_v11, 0.0 }
 0x3d2   :  { %v1702_v12 = vadd.f32 1e-07, %v1700_v7  ;;  %v1358_v53 = vpop.f32.mrf.mxu2  ;;  %v1510_v28 = vmax.f32 %v3486_v18, 0.0 }
 0x3d3   :  { %v1857_v22 = vadd.f32 -0.9189385, %v1679_v44  ;;  %v1359_v36 = vadd.f32 %v1358_v53, %v3748_v37 }
 0x3d4   :  { %1908 = vlog2.f32 %v1702_v12 }
 0x3d5   :  { %v1692_v4 = vsub.f32 %v1857_v22, %v1688_v9  ;;  %v1344_v22 = vadd.f32 %v3524_v43, %v3724_v25  ;;  %v1520_v25 = vmax.f32 %v3518_v54, 0.0  ;;  %v1518_v43 = vmax.f32 %v3515_v45, 0.0 }
 0x3d6   :  { %v1459_v58 = vpop.f32.mrf.mxu3 }
 0x3d7   :  { %v1460_v20 = vadd.f32 %v1459_v58, %v1347_v8  ;;  %v1457_v9 = vadd.f32 %v1456_v21, %v1344_v22  ;;  %v1516_v21 = vmax.f32 %v3509_v56, 0.0  ;;  %v1514_v58 = vmax.f32 %v3499_v63, 0.0 }
 0x3d9   :  { %v1528_v39 = vmax.f32 %v1457_v9, 0.0 }
 0x3da   :  { %v1909_v2 = vpop.eup %1908  ;;  %v1361_v17 = vpop.f32.mrf.mxu2 }
 0x3db   :  { %v1705_v40 = vmul.f32 0.6931472, %v1909_v2  ;;  %v1362_v16 = vadd.f32 %v1361_v17, %v3749_v1  ;;  %v1689_v17 = vld.sshfl [vmem:[#allocation1 + $0x8] sm:$0xff pattern:$0x75316420] }
 0x3dd   :  { %v1710_v33 = vrot.slane %v1705_v40, 4  ;;  %v1530_v40 = vmax.f32 %v1460_v20, 0.0 }
 0x3de   :  { %v1462_v61 = vpop.f32.mrf.mxu3 }
 0x3df   :  { %v1714_v23 = vsub.f32 %v1692_v4, %v1710_v33  ;;  %v1463_v12 = vadd.f32 %v1462_v61, %v1350_v59 }
 0x3e1   :  { %v1718_v48 = vrot.slane %v1714_v23, 4  ;;  %v1532_v29 = vmax.f32 %v1463_v12, 0.0 }
 0x3e3   :  { %v1723_v62 = vsel %vm1722_vm3, %v1718_v48, 0.0 }
 0x3e4   :  { %v1724_v19 = vrot.slane %v1723_v62, 4 }
 0x3e6   :  { %v1465_v60 = vpop.f32.mrf.mxu3  ;;  %v1725_v24 = vadd.f32 %v1724_v19, %v1723_v62 }
 0x3e7   :  { %v1466_v32 = vadd.f32 %v1465_v60, %v1353_v57 }
 0x3e8   :  { %v1726_v10 = vrot.slane %v1725_v24, 2 }
 0x3e9   :  { %v1534_v2 = vmax.f32 %v1466_v32, 0.0 }
 0x3ea   :  { %v1727_v3 = vadd.f32 %v1726_v10, %v1725_v24 }
 0x3ec   :  { %v1728_v38 = vrot.slane %v1727_v3, 1 }
 0x3ee   :  { %v1468_v30 = vpop.f32.mrf.mxu3  ;;  %v1729_v42 = vadd.f32 %v1728_v38, %v1727_v3 }
 0x3ef   :  { %v1469_v52 = vadd.f32 %v1468_v30, %v1356_v41 }
 0x3f0   :  { %v1741_v34 = vsel %vm1722_vm3, %v1859_v15, %v1729_v42 }
 0x3f1   :  { %1743 = vst [vmem:[#allocation2] sm:$0x1f] %v1741_v34  ;;  %v1536_v44 = vmax.f32 %v1469_v52, 0.0 }
 0x3f6   :  { %v1471_v27 = vpop.f32.mrf.mxu3 }
 0x3f7   :  { %v1472_v14 = vadd.f32 %v1471_v27, %v1359_v36 }
 0x3f9   :  { %v1538_v7 = vmax.f32 %v1472_v14, 0.0 }
 0x3fe   :  { %v1474_v47 = vpop.f32.mrf.mxu3 }
 0x3ff   :  { %v1475_v51 = vadd.f32 %v1474_v47, %v1362_v16 }
 0x401   :  { %v1540_v26 = vmax.f32 %v1475_v51, 0.0 }
 0x403   :  { %1609 = vmatpush.msrb.mxu1 %v1540_v26 }
 0x405   :  { %1610 = vmatpush.msrb.mxu1 %v1538_v7 }
 0x407   :  { %1611 = vmatpush.msrb.mxu1 %v1536_v44 }
 0x409   :  { %1612 = vmatpush.msrb.mxu1 %v1534_v2 }
 0x40b   :  { %1613 = vmatpush.msrb.mxu1 %v1532_v29 }
 0x40d   :  { %1614 = vmatpush.msrb.mxu1 %v1530_v40 }
 0x40f   :  { %1615 = vmatpush.msrb.mxu1 %v1528_v39 }
 0x411   :  { %1616 = vmatpush.msrb.mxu1 %v1526_v55 }
 0x413   :  { %1617 = vmatpush.msrb.mxu1 %v1524_v50 }
 0x415   :  { %1618 = vmatpush.msrb.mxu1 %v1522_v35 }
 0x417   :  { %1619 = vmatpush.msrb.mxu1 %v1520_v25 }
 0x419   :  { %1620 = vmatpush.msrb.mxu1 %v1518_v43 }
 0x41b   :  { %1621 = vmatpush.msrb.mxu1 %v1516_v21 }
 0x41d   :  { %1622 = vmatpush.msrb.mxu1 %v1514_v58 }
 0x41f   :  { %1623 = vmatpush.msrb.mxu1 %v1512_v6  ;;  %v1606_v54 = vpop.f32.mrf.mxu0 }
 0x420   :  { %v1607_v11 = vadd.f32 %v1606_v54, %v3503_v31 }
 0x421   :  { %1624 = vmatpush.msrb.mxu1 %v1510_v28 }
 0x422   :  { %1625 = vmatmul.f32.vlgmr.msrb.gmra.mxu1 %v3445_v46 }
 0x49f   :  { %v1626_v45 = vpop.f32.mrf.mxu1 }
 0x4a0   :  { %v1627_v13 = vadd.f32 %v1626_v45, %v1607_v11 }
 0x4a2   :  { %v1632_v4 = vmin.f32 %v1627_v13, 20.0  ;;  %vm1630_vm5 = vcmp.gt.f32.partialorder %v1627_v13, 20.0 }
 0x4a4   :  { %v1635_v56 = vmul.f32 1.442695, %v1632_v4 }
 0x4a6   :  { %1910 = vpow2.f32 %v1635_v56 }
 0x4ac   :  { %v1911_v33 = vpop.eup %1910 }
 0x4ad   :  { %v1646_v63 = vadd.f32 1.0, %v1911_v33  ;;  %v1649_v61 = vmul.f32 -0.5, %v1911_v33  ;;  %v1652_v23 = vand.u32 2147483647, %v1911_v33 }
 0x4af   :  { %1912 = vlog2.f32 %v1646_v63  ;;  %v1650_v0 = vadd.f32 1.0, %v1649_v61  ;;  %vm1653_vm4 = vcmp.lt.f32.partialorder %v1652_v23, 0.0004427343 }
 0x4b1   :  { %v1651_v62 = vmul.f32 %v1911_v33, %v1650_v0 }
 0x4b5   :  { %v1913_v48 = vpop.eup %1912 }
 0x4b6   :  { %v1648_v18 = vmul.f32 0.6931472, %v1913_v48 }
 0x4b8   :  { %v1654_v46 = vsel %vm1653_vm4, %v1651_v62, %v1648_v18 }
 0x4b9   :  { %v1656_v19 = vsel %vm1630_vm5, %v1627_v13, %v1654_v46 }
 0x4ba   :  { %v1666_v31 = vmul.f32 %v3511_v49, %v1656_v19 }
 0x4bc   :  { %v1670_v5 = vrot.slane %v1666_v31, 4 }
 0x4be   :  { %v1674_v60 = vadd.f32 %v1670_v5, %v1627_v13 }
 0x4c0   :  { %1914 = vtanh.f32 %v1674_v60 }
 0x4c6   :  { %v1915_v24 = vpop.eup %1914 }
 0x4c7   :  { %1916 = vtanh.f32 %v1915_v24  ;;  %v1860_v59 = vclamps-f32 %v1915_v24, 1.0 }
 0x4c8   :  { %1918 = vlog2.f32 %v1656_v19 }
 0x4cd   :  { %v1917_v10 = vpop.eup %1916 }
 0x4ce   :  { %v1919_v3 = vpop.eup %1918  ;;  %v1699_v38 = vmul.f32 %v1917_v10, %v1917_v10 }
 0x4cf   :  { %v1678_v42 = vmul.f32 0.6931472, %v1919_v3 }
 0x4d0   :  { %v1701_v30 = vsub.f32 1.0, %v1699_v38 }
 0x4d1   :  { %v1680_v53 = vsub.f32 0.0, %v1678_v42 }
 0x4d2   :  { %v1703_v15 = vadd.f32 1e-07, %v1701_v30 }
 0x4d3   :  { %v1858_v34 = vadd.f32 -0.9189385, %v1680_v53 }
 0x4d4   :  { %1920 = vlog2.f32 %v1703_v15 }
 0x4d5   :  { %v1693_v36 = vsub.f32 %v1858_v34, %v1689_v17 }
 0x4da   :  { %v1921_v27 = vpop.eup %1920 }
 0x4db   :  { %v1707_v37 = vmul.f32 0.6931472, %v1921_v27 }
 0x4dd   :  { %v1711_v49 = vrot.slane %v1707_v37, 4 }
 0x4df   :  { %v1715_v1 = vsub.f32 %v1693_v36, %v1711_v49 }
 0x4e1   :  { %v1719_v16 = vrot.slane %v1715_v1, 4 }
 0x4e3   :  { %v1730_v47 = vsel %vm1722_vm3, %v1719_v16, 0.0 }
 0x4e4   :  { %v1731_v41 = vrot.slane %v1730_v47, 4 }
 0x4e6   :  { %v1732_v14 = vadd.f32 %v1731_v41, %v1730_v47 }
 0x4e8   :  { %v1733_v51 = vrot.slane %v1732_v14, 2 }
 0x4ea   :  { %v1734_v57 = vadd.f32 %v1733_v51, %v1732_v14 }
 0x4ec   :  { %v1735_v52 = vrot.slane %v1734_v57, 1 }
 0x4ee   :  { %v1736_v26 = vadd.f32 %v1735_v52, %v1734_v57 }
 0x4f0   :  { %v1742_v32 = vsel %vm1722_vm3, %v1860_v59, %v1736_v26 }
 0x4f1   :  { %1744 = vst [vmem:[#allocation2 + $0x8] sm:$0x1f] %v1742_v32 }
 0x4f2   :  { %1755 = dma.vmem_to_hbm [thread:$0]  %s1751_s28, 256, %s1753_s2, [#allocation3]  }
 0x4f3   :  { %1946 = dma.done.wait [#allocation3], 256  }
 0x4f4   :  { %1947 = vsyncadd [#allocation3], 4294967040 }
 0x4f5   :  { %1760 = vsyncpa [#allocation3], 1 }

</bundles_post_ra>
